<compile_context>
chip_gen: v5e
topology: v5e:2x2
jax: 0.10.0
libtpu: 0.0.40
codegen_flags: <defaults>
</compile_context>

<pallas_src>
import functools

import jax
import jax.numpy as jnp
from jax import lax
from jax.experimental import pallas as pl
from jax.experimental.pallas import tpu as pltpu


def _round_up(x, m):
    return (x + m - 1) // m * m


def _csppc_kernel(x_ref, w1_ref, w2_ref, o_ref, xf_ref, patch_ref,
                  *, c, cp, H, W, cdt):
    """Fused CSPPC bottleneck for Nb images.

    x_ref    : (Nb, cb, S)  input block (cb = min(round_up(c, 8), dim))
    w1_ref   : (c, 9*cp)    layer-1 weight, columns = (kh*3+kw)*cp + ci
    w2_ref   : (c, 9*cp)    layer-2 weight, same layout
    o_ref    : (Nb, cb, S)  output block (HBM buffer aliases the input array)
    xf_ref   : (c, L)       flat, vertically zero-padded conv operand, L=S+2W+2
    patch_ref: (9*cp, S)    im2col-style tap scratch (one store per tap)
    """
    S = H * W
    Nb = x_ref.shape[0]
    cb = x_ref.shape[1]

    # Hoisted horizontal edge masks, broadcast to (c, S) ONCE (JAX does not CSE
    # broadcast_in_dim; previously 12 per-kh re-broadcasts per image).
    w_pos = lax.broadcasted_iota(jnp.int32, (1, S), 1) % W
    not_left = jnp.broadcast_to(w_pos != 0, (c, S))
    not_right = jnp.broadcast_to(w_pos != (W - 1), (c, S))
    zero = jnp.zeros((), cdt)

    # Zero the top/bottom halo once (interior fully overwritten per layer), and
    # zero the alignment-padded tap rows once (they carry zero weight, but
    # 0 * uninitialised-garbage could be NaN).
    xf_ref[:, :W + 1] = jnp.zeros((c, W + 1), cdt)
    xf_ref[:, W + 1 + S:] = jnp.zeros((c, W + 1), cdt)
    if cp > c:
        patch_ref[...] = jnp.zeros((9 * cp, S), cdt)

    def build_patch():
        # One store per tap (9 per conv); only the kw=0/2 edge taps need a
        # masked value.  Tap t = kh*3 + kw lives at patch rows [t*cp, t*cp+c).
        for kh in range(3):
            base = kh * W
            t0 = kh * 3 * cp
            patch_ref[t0:t0 + c, :] = jnp.where(
                not_left, xf_ref[:, base:base + S], zero)
            patch_ref[t0 + cp:t0 + cp + c, :] = xf_ref[:, base + 1:base + 1 + S]
            patch_ref[t0 + 2 * cp:t0 + 2 * cp + c, :] = jnp.where(
                not_right, xf_ref[:, base + 2:base + 2 + S], zero)

    for i in range(Nb):  # static unroll over the images of this grid step
        # Layer 1: Partial_conv3 #1 on the first c channels.
        xf_ref[:, W + 1:W + 1 + S] = x_ref[i, :c, :].astype(cdt)
        build_patch()
        y1 = jnp.dot(w1_ref[...], patch_ref[...],
                     preferred_element_type=jnp.float32)

        # Layer 2: Partial_conv3 #2 consumes y1 straight from VMEM.
        xf_ref[:, W + 1:W + 1 + S] = y1.astype(cdt)
        build_patch()
        y2 = jnp.dot(w2_ref[...], patch_ref[...],
                     preferred_element_type=jnp.float32)

        o_ref[i, :c, :] = y2.astype(o_ref.dtype)
        if cb > c:
            # Alignment rows (c..cb) only: pass through inside the kernel.
            # The remaining channels never enter the block (aliased in HBM).
            o_ref[i, c:, :] = x_ref[i, c:, :]


def csppc_bottleneck(x, w1, w2, *, compute_dtype=jnp.bfloat16):
    """Forward pass of CSPPC_Bottleneck(dim): two Partial_conv3(dim, n_div=4).

    NOTE: pass-through channels cost zero HBM traffic only if the caller
    donates `x` (e.g. jax.jit(..., donate_argnums=(0,))); otherwise XLA inserts
    a copy to satisfy the alias (still correct, just slower).
    """
    N, dim, H, W = x.shape
    assert dim % 4 == 0
    c = dim // 4
    assert w1.shape == (c, c, 3, 3) and w2.shape == (c, c, 3, 3)

    S = H * W
    L = S + 2 * W + 2
    cp = _round_up(c, 8)          # sublane-aligned tap stride in the patch
    cb = min(cp, dim)             # channels covered by the kernel's block

    # Amortise per-grid-step overhead for tiny per-image work by packing
    # several images into one step (largest divisor of N, capped at 8).
    Nb = 1
    if c * S <= (1 << 16):
        for d in range(min(N, 8), 0, -1):
            if N % d == 0:
                Nb = d
                break

    # Free, layout-preserving view + tiny weight folds (no full-tensor glue).
    x_flat = x.reshape(N, dim, S)

    def fold(w):
        # (co, ci, kh, kw) -> (co, kh, kw, ci), pad ci -> cp, -> (c, 9*cp)
        wt = jnp.transpose(w, (0, 2, 3, 1))
        if cp > c:
            wt = jnp.pad(wt, ((0, 0), (0, 0), (0, 0), (0, cp - c)))
        return wt.reshape(c, 9 * cp).astype(compute_dtype)

    w1f, w2f = fold(w1), fold(w2)

    kernel = functools.partial(_csppc_kernel, c=c, cp=cp, H=H, W=W,
                               cdt=compute_dtype)

    # Size the scoped VMEM limit from the actual per-step buffers (+ headroom).
    io_b = jnp.dtype(x.dtype).itemsize
    cd_b = jnp.dtype(compute_dtype).itemsize
    blk = Nb * cb * S * io_b
    needed = (2 * 2 * blk                        # in + out blocks, double-buffered
              + 2 * 2 * c * 9 * cp * cd_b        # both folded weights
              + c * L * cd_b                     # xf scratch
              + 9 * cp * S * cd_b                # patch scratch
              + 6 * c * S * 4)                   # f32 acc / cast temps headroom
    vmem_limit = int(min(max(needed * 1.4, 16 * 2 ** 20), 64 * 2 ** 20))

    out_flat = pl.pallas_call(
        kernel,
        out_shape=jax.ShapeDtypeStruct((N, dim, S), x.dtype),
        grid_spec=pltpu.PrefetchScalarGridSpec(
            num_scalar_prefetch=0,
            grid=(N // Nb,),
            in_specs=[
                pl.BlockSpec((Nb, cb, S), lambda n: (n, 0, 0)),
                pl.BlockSpec((c, 9 * cp), lambda n: (0, 0)),
                pl.BlockSpec((c, 9 * cp), lambda n: (0, 0)),
            ],
            out_specs=pl.BlockSpec((Nb, cb, S), lambda n: (n, 0, 0)),
            scratch_shapes=[
                pltpu.VMEM((c, L), compute_dtype),
                pltpu.VMEM((9 * cp, S), compute_dtype),
            ],
        ),
        # Output aliases the input: channels the grid never writes (cb..dim)
        # keep their original values with zero kernel HBM traffic.
        input_output_aliases={0: 0},
        compiler_params=pltpu.CompilerParams(
            dimension_semantics=("parallel",),
            vmem_limit_bytes=vmem_limit,
        ),
    )(x_flat, w1f, w2f)

    return out_flat.reshape(N, dim, H, W)


# ----------------------------- reference ---------------------------------- #

def _reference_conv3x3(x, w):
    return lax.conv_general_dilated(
        x, w, window_strides=(1, 1), padding=((1, 1), (1, 1)),
        dimension_numbers=("NCHW", "OIHW", "NCHW"),
        precision=lax.Precision.HIGHEST)


def _reference_module(x, w1, w2):
    c = x.shape[1] // 4
    y = jnp.concatenate([_reference_conv3x3(x[:, :c], w1), x[:, c:]], axis=1)
    y = jnp.concatenate([_reference_conv3x3(y[:, :c], w2), y[:, c:]], axis=1)
    return y


if __name__ == "__main__":
    def run_case(N, dim, H, W):
        c = dim // 4
        key = jax.random.PRNGKey(0)
        kx, kw1, kw2 = jax.random.split(key, 3)
        x = jax.random.normal(kx, (N, dim, H, W), dtype=jnp.float32)
        # nn.Conv2d(c, c, 3, 1, 1, bias=False) weights: (Cout, Cin, 3, 3)
        w1 = jax.random.normal(kw1, (c, c, 3, 3), dtype=jnp.float32) * 0.1
        w2 = jax.random.normal(kw2, (c, c, 3, 3), dtype=jnp.float32) * 0.1

        ref = jax.block_until_ready(_reference_module(x, w1, w2))

        # Donate x so input_output_aliases really aliases (no hidden copy).
        fwd = jax.jit(csppc_bottleneck, donate_argnums=(0,))
        out = jax.block_until_ready(fwd(x, w1, w2))

        assert out.shape == (N, dim, H, W)
        # Untouched channels are passed through bit-exactly.
        assert jnp.array_equal(out[:, c:], ref[:, c:])
        # Conv channels: bf16 MXU operands with f32 accumulation.
        assert jnp.allclose(out[:, :c], ref[:, :c], atol=5e-2, rtol=5e-2)

    # Aligned path: dim=32 -> c=8 conv channels, 24 aliased pass-through chans.
    run_case(N=2, dim=32, H=16, W=16)
    # Padded path: dim=16 -> c=4 (block covers 8 channels, rows 4..8 passed
    # through in-kernel, rows 8..16 aliased in HBM).
    run_case(N=2, dim=16, H=16, W=16)

    print("KERNEL_OK")
</pallas_src>

<mosaic_0001>
module attributes {stable_mosaic.version = 11 : i64} {
  func.func @_csppc_kernel(%arg0: i32, %arg1: memref<2x8x256xf32, #tpu.memory_space<vmem>>, %arg2: memref<8x72xbf16, #tpu.memory_space<vmem>>, %arg3: memref<8x72xbf16, #tpu.memory_space<vmem>>, %arg4: memref<2x8x256xf32, #tpu.memory_space<vmem>>, %arg5: memref<8x290xbf16, #tpu.memory_space<vmem>>, %arg6: memref<72x256xbf16, #tpu.memory_space<vmem>>) attributes {dimension_semantics = [#tpu.dimension_semantics<parallel>], iteration_bounds = array<i64: 1>, scalar_prefetch = 0 : i64, scratch_operands = 2 : i64, tpu.core_type = #tpu.core_type<tc>, window_params = [{transform_indices = @transform_0, window_bounds = array<i64: 2, 8, 256>}, {pipeline_mode = #tpu.pipeline_mode<synchronous>, transform_indices = @transform_1, window_bounds = array<i64: 8, 72>}, {pipeline_mode = #tpu.pipeline_mode<synchronous>, transform_indices = @transform_2, window_bounds = array<i64: 8, 72>}, {transform_indices = @transform_3, window_bounds = array<i64: 2, 8, 256>}]} {
    %0 = tpu.iota {dimensions = array<i32: 1>} : vector<1x256xi32>
    %c16_i32 = arith.constant 16 : i32
    %c0_i32 = arith.constant 0 : i32
    %1 = arith.cmpi eq, %c16_i32, %c0_i32 : i32
    %c1_i32 = arith.constant 1 : i32
    %2 = arith.select %1, %c1_i32, %c16_i32 : i32
    %3 = vector.broadcast %2 : i32 to vector<1x256xi32>
    %4 = arith.remsi %0, %3 : vector<1x256xi32>
    %c0_i32_0 = arith.constant 0 : i32
    %5 = vector.broadcast %c0_i32_0 : i32 to vector<1x256xi32>
    %6 = arith.cmpi ne, %4, %5 : vector<1x256xi32>
    %c0_i32_1 = arith.constant 0 : i32
    %7 = vector.broadcast %c0_i32_1 : i32 to vector<1x256xi32>
    %8 = arith.cmpi slt, %4, %7 : vector<1x256xi32>
    %c0_i32_2 = arith.constant 0 : i32
    %9 = arith.cmpi slt, %2, %c0_i32_2 : i32
    %10 = vector.broadcast %9 : i1 to vector<1x256xi1>
    %11 = vector.broadcast %10 : vector<1x256xi1> to vector<1x256xi1>
    %12 = arith.xori %8, %11 : vector<1x256xi1>
    %13 = arith.andi %12, %6 : vector<1x256xi1>
    %14 = vector.broadcast %2 : i32 to vector<1x256xi32>
    %15 = arith.addi %4, %14 : vector<1x256xi32>
    %16 = arith.select %13, %15, %4 : vector<1x256xi1>, vector<1x256xi32>
    %c0_i32_3 = arith.constant 0 : i32
    %17 = vector.broadcast %c0_i32_3 : i32 to vector<1x256xi32>
    %18 = arith.cmpi ne, %16, %17 : vector<1x256xi32>
    %19 = vector.shape_cast %18 : vector<1x256xi1> to vector<1x256xi1>
    %20 = vector.broadcast %19 : vector<1x256xi1> to vector<8x256xi1>
    %c15_i32 = arith.constant 15 : i32
    %21 = vector.broadcast %c15_i32 : i32 to vector<1x256xi32>
    %22 = arith.cmpi ne, %16, %21 : vector<1x256xi32>
    %23 = vector.shape_cast %22 : vector<1x256xi1> to vector<1x256xi1>
    %24 = vector.broadcast %23 : vector<1x256xi1> to vector<8x256xi1>
    %cst = arith.constant 0.000000e+00 : bf16
    %25 = vector.broadcast %cst : bf16 to vector<8x17xbf16>
    %c0 = arith.constant 0 : index
    %c0_4 = arith.constant 0 : index
    %26 = vector.load %arg5[%c0, %c0_4] : memref<8x290xbf16, #tpu.memory_space<vmem>>, vector<8x17xbf16>
    tpu.vector_store %arg5[%c0, %c0_4], %25 {strides = array<i32>} : memref<8x290xbf16, #tpu.memory_space<vmem>>, vector<8x17xbf16>,
    %cst_5 = arith.constant 0.000000e+00 : bf16
    %27 = vector.broadcast %cst_5 : bf16 to vector<8x17xbf16>
    %c0_6 = arith.constant 0 : index
    %c273 = arith.constant 273 : index
    %28 = vector.load %arg5[%c0_6, %c273] : memref<8x290xbf16, #tpu.memory_space<vmem>>, vector<8x17xbf16>
    tpu.vector_store %arg5[%c0_6, %c273], %27 {strides = array<i32>} : memref<8x290xbf16, #tpu.memory_space<vmem>>, vector<8x17xbf16>,
    %c0_7 = arith.constant 0 : index
    %c0_8 = arith.constant 0 : index
    %c0_9 = arith.constant 0 : index
    %29 = vector.load %arg1[%c0_7, %c0_8, %c0_9] : memref<2x8x256xf32, #tpu.memory_space<vmem>>, vector<1x8x256xf32>
    %30 = vector.shape_cast %29 : vector<1x8x256xf32> to vector<8x256xf32>
    %31 = arith.truncf %30 : vector<8x256xf32> to vector<8x256xbf16>
    %c0_10 = arith.constant 0 : index
    %c17 = arith.constant 17 : index
    %32 = vector.load %arg5[%c0_10, %c17] : memref<8x290xbf16, #tpu.memory_space<vmem>>, vector<8x256xbf16>
    tpu.vector_store %arg5[%c0_10, %c17], %31 {strides = array<i32>} : memref<8x290xbf16, #tpu.memory_space<vmem>>, vector<8x256xbf16>,
    %c0_11 = arith.constant 0 : index
    %c0_12 = arith.constant 0 : index
    %33 = vector.load %arg5[%c0_11, %c0_12] : memref<8x290xbf16, #tpu.memory_space<vmem>>, vector<8x256xbf16>
    %cst_13 = arith.constant 0.000000e+00 : bf16
    %34 = vector.broadcast %cst_13 : bf16 to vector<8x256xbf16>
    %35 = arith.select %20, %33, %34 : vector<8x256xi1>, vector<8x256xbf16>
    %c0_14 = arith.constant 0 : index
    %c0_15 = arith.constant 0 : index
    %36 = vector.load %arg6[%c0_14, %c0_15] : memref<72x256xbf16, #tpu.memory_space<vmem>>, vector<8x256xbf16>
    tpu.vector_store %arg6[%c0_14, %c0_15], %35 {strides = array<i32>} : memref<72x256xbf16, #tpu.memory_space<vmem>>, vector<8x256xbf16>,
    %c0_16 = arith.constant 0 : index
    %c1 = arith.constant 1 : index
    %37 = vector.load %arg5[%c0_16, %c1] : memref<8x290xbf16, #tpu.memory_space<vmem>>, vector<8x256xbf16>
    %c8 = arith.constant 8 : index
    %c0_17 = arith.constant 0 : index
    %38 = vector.load %arg6[%c8, %c0_17] : memref<72x256xbf16, #tpu.memory_space<vmem>>, vector<8x256xbf16>
    tpu.vector_store %arg6[%c8, %c0_17], %37 {strides = array<i32>} : memref<72x256xbf16, #tpu.memory_space<vmem>>, vector<8x256xbf16>,
    %c0_18 = arith.constant 0 : index
    %c2 = arith.constant 2 : index
    %39 = vector.load %arg5[%c0_18, %c2] : memref<8x290xbf16, #tpu.memory_space<vmem>>, vector<8x256xbf16>
    %cst_19 = arith.constant 0.000000e+00 : bf16
    %40 = vector.broadcast %cst_19 : bf16 to vector<8x256xbf16>
    %41 = arith.select %24, %39, %40 : vector<8x256xi1>, vector<8x256xbf16>
    %c16 = arith.constant 16 : index
    %c0_20 = arith.constant 0 : index
    %42 = vector.load %arg6[%c16, %c0_20] : memref<72x256xbf16, #tpu.memory_space<vmem>>, vector<8x256xbf16>
    tpu.vector_store %arg6[%c16, %c0_20], %41 {strides = array<i32>} : memref<72x256xbf16, #tpu.memory_space<vmem>>, vector<8x256xbf16>,
    %c0_21 = arith.constant 0 : index
    %c16_22 = arith.constant 16 : index
    %43 = vector.load %arg5[%c0_21, %c16_22] : memref<8x290xbf16, #tpu.memory_space<vmem>>, vector<8x256xbf16>
    %cst_23 = arith.constant 0.000000e+00 : bf16
    %44 = vector.broadcast %cst_23 : bf16 to vector<8x256xbf16>
    %45 = arith.select %20, %43, %44 : vector<8x256xi1>, vector<8x256xbf16>
    %c24 = arith.constant 24 : index
    %c0_24 = arith.constant 0 : index
    %46 = vector.load %arg6[%c24, %c0_24] : memref<72x256xbf16, #tpu.memory_space<vmem>>, vector<8x256xbf16>
    tpu.vector_store %arg6[%c24, %c0_24], %45 {strides = array<i32>} : memref<72x256xbf16, #tpu.memory_space<vmem>>, vector<8x256xbf16>,
    %c0_25 = arith.constant 0 : index
    %c17_26 = arith.constant 17 : index
    %47 = vector.load %arg5[%c0_25, %c17_26] : memref<8x290xbf16, #tpu.memory_space<vmem>>, vector<8x256xbf16>
    %c32 = arith.constant 32 : index
    %c0_27 = arith.constant 0 : index
    %48 = vector.load %arg6[%c32, %c0_27] : memref<72x256xbf16, #tpu.memory_space<vmem>>, vector<8x256xbf16>
    tpu.vector_store %arg6[%c32, %c0_27], %47 {strides = array<i32>} : memref<72x256xbf16, #tpu.memory_space<vmem>>, vector<8x256xbf16>,
    %c0_28 = arith.constant 0 : index
    %c18 = arith.constant 18 : index
    %49 = vector.load %arg5[%c0_28, %c18] : memref<8x290xbf16, #tpu.memory_space<vmem>>, vector<8x256xbf16>
    %cst_29 = arith.constant 0.000000e+00 : bf16
    %50 = vector.broadcast %cst_29 : bf16 to vector<8x256xbf16>
    %51 = arith.select %24, %49, %50 : vector<8x256xi1>, vector<8x256xbf16>
    %c40 = arith.constant 40 : index
    %c0_30 = arith.constant 0 : index
    %52 = vector.load %arg6[%c40, %c0_30] : memref<72x256xbf16, #tpu.memory_space<vmem>>, vector<8x256xbf16>
    tpu.vector_store %arg6[%c40, %c0_30], %51 {strides = array<i32>} : memref<72x256xbf16, #tpu.memory_space<vmem>>, vector<8x256xbf16>,
    %c0_31 = arith.constant 0 : index
    %c32_32 = arith.constant 32 : index
    %53 = vector.load %arg5[%c0_31, %c32_32] : memref<8x290xbf16, #tpu.memory_space<vmem>>, vector<8x256xbf16>
    %cst_33 = arith.constant 0.000000e+00 : bf16
    %54 = vector.broadcast %cst_33 : bf16 to vector<8x256xbf16>
    %55 = arith.select %20, %53, %54 : vector<8x256xi1>, vector<8x256xbf16>
    %c48 = arith.constant 48 : index
    %c0_34 = arith.constant 0 : index
    %56 = vector.load %arg6[%c48, %c0_34] : memref<72x256xbf16, #tpu.memory_space<vmem>>, vector<8x256xbf16>
    tpu.vector_store %arg6[%c48, %c0_34], %55 {strides = array<i32>} : memref<72x256xbf16, #tpu.memory_space<vmem>>, vector<8x256xbf16>,
    %c0_35 = arith.constant 0 : index
    %c33 = arith.constant 33 : index
    %57 = vector.load %arg5[%c0_35, %c33] : memref<8x290xbf16, #tpu.memory_space<vmem>>, vector<8x256xbf16>
    %c56 = arith.constant 56 : index
    %c0_36 = arith.constant 0 : index
    %58 = vector.load %arg6[%c56, %c0_36] : memref<72x256xbf16, #tpu.memory_space<vmem>>, vector<8x256xbf16>
    tpu.vector_store %arg6[%c56, %c0_36], %57 {strides = array<i32>} : memref<72x256xbf16, #tpu.memory_space<vmem>>, vector<8x256xbf16>,
    %c0_37 = arith.constant 0 : index
    %c34 = arith.constant 34 : index
    %59 = vector.load %arg5[%c0_37, %c34] : memref<8x290xbf16, #tpu.memory_space<vmem>>, vector<8x256xbf16>
    %cst_38 = arith.constant 0.000000e+00 : bf16
    %60 = vector.broadcast %cst_38 : bf16 to vector<8x256xbf16>
    %61 = arith.select %24, %59, %60 : vector<8x256xi1>, vector<8x256xbf16>
    %c64 = arith.constant 64 : index
    %c0_39 = arith.constant 0 : index
    %62 = vector.load %arg6[%c64, %c0_39] : memref<72x256xbf16, #tpu.memory_space<vmem>>, vector<8x256xbf16>
    tpu.vector_store %arg6[%c64, %c0_39], %61 {strides = array<i32>} : memref<72x256xbf16, #tpu.memory_space<vmem>>, vector<8x256xbf16>,
    %c0_40 = arith.constant 0 : index
    %c0_41 = arith.constant 0 : index
    %63 = vector.load %arg2[%c0_40, %c0_41] : memref<8x72xbf16, #tpu.memory_space<vmem>>, vector<8x72xbf16>
    %c0_42 = arith.constant 0 : index
    %c0_43 = arith.constant 0 : index
    %64 = vector.load %arg6[%c0_42, %c0_43] : memref<72x256xbf16, #tpu.memory_space<vmem>>, vector<72x256xbf16>
    %cst_44 = arith.constant dense<0.000000e+00> : vector<8x256xf32>
    %65 = tpu.matmul %63, %64, %cst_44 {dimension_numbers = #tpu.dot_dimension_numbers<[1], [0], [0], [1], [0, 0, 1, 1], [], []>} : vector<8x72xbf16>, vector<72x256xbf16>, vector<8x256xf32> -> vector<8x256xf32>
    %66 = arith.truncf %65 : vector<8x256xf32> to vector<8x256xbf16>
    %c0_45 = arith.constant 0 : index
    %c17_46 = arith.constant 17 : index
    %67 = vector.load %arg5[%c0_45, %c17_46] : memref<8x290xbf16, #tpu.memory_space<vmem>>, vector<8x256xbf16>
    tpu.vector_store %arg5[%c0_45, %c17_46], %66 {strides = array<i32>} : memref<8x290xbf16, #tpu.memory_space<vmem>>, vector<8x256xbf16>,
    %c0_47 = arith.constant 0 : index
    %c0_48 = arith.constant 0 : index
    %68 = vector.load %arg5[%c0_47, %c0_48] : memref<8x290xbf16, #tpu.memory_space<vmem>>, vector<8x256xbf16>
    %cst_49 = arith.constant 0.000000e+00 : bf16
    %69 = vector.broadcast %cst_49 : bf16 to vector<8x256xbf16>
    %70 = arith.select %20, %68, %69 : vector<8x256xi1>, vector<8x256xbf16>
    %c0_50 = arith.constant 0 : index
    %c0_51 = arith.constant 0 : index
    %71 = vector.load %arg6[%c0_50, %c0_51] : memref<72x256xbf16, #tpu.memory_space<vmem>>, vector<8x256xbf16>
    tpu.vector_store %arg6[%c0_50, %c0_51], %70 {strides = array<i32>} : memref<72x256xbf16, #tpu.memory_space<vmem>>, vector<8x256xbf16>,
    %c0_52 = arith.constant 0 : index
    %c1_53 = arith.constant 1 : index
    %72 = vector.load %arg5[%c0_52, %c1_53] : memref<8x290xbf16, #tpu.memory_space<vmem>>, vector<8x256xbf16>
    %c8_54 = arith.constant 8 : index
    %c0_55 = arith.constant 0 : index
    %73 = vector.load %arg6[%c8_54, %c0_55] : memref<72x256xbf16, #tpu.memory_space<vmem>>, vector<8x256xbf16>
    tpu.vector_store %arg6[%c8_54, %c0_55], %72 {strides = array<i32>} : memref<72x256xbf16, #tpu.memory_space<vmem>>, vector<8x256xbf16>,
    %c0_56 = arith.constant 0 : index
    %c2_57 = arith.constant 2 : index
    %74 = vector.load %arg5[%c0_56, %c2_57] : memref<8x290xbf16, #tpu.memory_space<vmem>>, vector<8x256xbf16>
    %cst_58 = arith.constant 0.000000e+00 : bf16
    %75 = vector.broadcast %cst_58 : bf16 to vector<8x256xbf16>
    %76 = arith.select %24, %74, %75 : vector<8x256xi1>, vector<8x256xbf16>
    %c16_59 = arith.constant 16 : index
    %c0_60 = arith.constant 0 : index
    %77 = vector.load %arg6[%c16_59, %c0_60] : memref<72x256xbf16, #tpu.memory_space<vmem>>, vector<8x256xbf16>
    tpu.vector_store %arg6[%c16_59, %c0_60], %76 {strides = array<i32>} : memref<72x256xbf16, #tpu.memory_space<vmem>>, vector<8x256xbf16>,
    %c0_61 = arith.constant 0 : index
    %c16_62 = arith.constant 16 : index
    %78 = vector.load %arg5[%c0_61, %c16_62] : memref<8x290xbf16, #tpu.memory_space<vmem>>, vector<8x256xbf16>
    %cst_63 = arith.constant 0.000000e+00 : bf16
    %79 = vector.broadcast %cst_63 : bf16 to vector<8x256xbf16>
    %80 = arith.select %20, %78, %79 : vector<8x256xi1>, vector<8x256xbf16>
    %c24_64 = arith.constant 24 : index
    %c0_65 = arith.constant 0 : index
    %81 = vector.load %arg6[%c24_64, %c0_65] : memref<72x256xbf16, #tpu.memory_space<vmem>>, vector<8x256xbf16>
    tpu.vector_store %arg6[%c24_64, %c0_65], %80 {strides = array<i32>} : memref<72x256xbf16, #tpu.memory_space<vmem>>, vector<8x256xbf16>,
    %c0_66 = arith.constant 0 : index
    %c17_67 = arith.constant 17 : index
    %82 = vector.load %arg5[%c0_66, %c17_67] : memref<8x290xbf16, #tpu.memory_space<vmem>>, vector<8x256xbf16>
    %c32_68 = arith.constant 32 : index
    %c0_69 = arith.constant 0 : index
    %83 = vector.load %arg6[%c32_68, %c0_69] : memref<72x256xbf16, #tpu.memory_space<vmem>>, vector<8x256xbf16>
    tpu.vector_store %arg6[%c32_68, %c0_69], %82 {strides = array<i32>} : memref<72x256xbf16, #tpu.memory_space<vmem>>, vector<8x256xbf16>,
    %c0_70 = arith.constant 0 : index
    %c18_71 = arith.constant 18 : index
    %84 = vector.load %arg5[%c0_70, %c18_71] : memref<8x290xbf16, #tpu.memory_space<vmem>>, vector<8x256xbf16>
    %cst_72 = arith.constant 0.000000e+00 : bf16
    %85 = vector.broadcast %cst_72 : bf16 to vector<8x256xbf16>
    %86 = arith.select %24, %84, %85 : vector<8x256xi1>, vector<8x256xbf16>
    %c40_73 = arith.constant 40 : index
    %c0_74 = arith.constant 0 : index
    %87 = vector.load %arg6[%c40_73, %c0_74] : memref<72x256xbf16, #tpu.memory_space<vmem>>, vector<8x256xbf16>
    tpu.vector_store %arg6[%c40_73, %c0_74], %86 {strides = array<i32>} : memref<72x256xbf16, #tpu.memory_space<vmem>>, vector<8x256xbf16>,
    %c0_75 = arith.constant 0 : index
    %c32_76 = arith.constant 32 : index
    %88 = vector.load %arg5[%c0_75, %c32_76] : memref<8x290xbf16, #tpu.memory_space<vmem>>, vector<8x256xbf16>
    %cst_77 = arith.constant 0.000000e+00 : bf16
    %89 = vector.broadcast %cst_77 : bf16 to vector<8x256xbf16>
    %90 = arith.select %20, %88, %89 : vector<8x256xi1>, vector<8x256xbf16>
    %c48_78 = arith.constant 48 : index
    %c0_79 = arith.constant 0 : index
    %91 = vector.load %arg6[%c48_78, %c0_79] : memref<72x256xbf16, #tpu.memory_space<vmem>>, vector<8x256xbf16>
    tpu.vector_store %arg6[%c48_78, %c0_79], %90 {strides = array<i32>} : memref<72x256xbf16, #tpu.memory_space<vmem>>, vector<8x256xbf16>,
    %c0_80 = arith.constant 0 : index
    %c33_81 = arith.constant 33 : index
    %92 = vector.load %arg5[%c0_80, %c33_81] : memref<8x290xbf16, #tpu.memory_space<vmem>>, vector<8x256xbf16>
    %c56_82 = arith.constant 56 : index
    %c0_83 = arith.constant 0 : index
    %93 = vector.load %arg6[%c56_82, %c0_83] : memref<72x256xbf16, #tpu.memory_space<vmem>>, vector<8x256xbf16>
    tpu.vector_store %arg6[%c56_82, %c0_83], %92 {strides = array<i32>} : memref<72x256xbf16, #tpu.memory_space<vmem>>, vector<8x256xbf16>,
    %c0_84 = arith.constant 0 : index
    %c34_85 = arith.constant 34 : index
    %94 = vector.load %arg5[%c0_84, %c34_85] : memref<8x290xbf16, #tpu.memory_space<vmem>>, vector<8x256xbf16>
    %cst_86 = arith.constant 0.000000e+00 : bf16
    %95 = vector.broadcast %cst_86 : bf16 to vector<8x256xbf16>
    %96 = arith.select %24, %94, %95 : vector<8x256xi1>, vector<8x256xbf16>
    %c64_87 = arith.constant 64 : index
    %c0_88 = arith.constant 0 : index
    %97 = vector.load %arg6[%c64_87, %c0_88] : memref<72x256xbf16, #tpu.memory_space<vmem>>, vector<8x256xbf16>
    tpu.vector_store %arg6[%c64_87, %c0_88], %96 {strides = array<i32>} : memref<72x256xbf16, #tpu.memory_space<vmem>>, vector<8x256xbf16>,
    %c0_89 = arith.constant 0 : index
    %c0_90 = arith.constant 0 : index
    %98 = vector.load %arg3[%c0_89, %c0_90] : memref<8x72xbf16, #tpu.memory_space<vmem>>, vector<8x72xbf16>
    %c0_91 = arith.constant 0 : index
    %c0_92 = arith.constant 0 : index
    %99 = vector.load %arg6[%c0_91, %c0_92] : memref<72x256xbf16, #tpu.memory_space<vmem>>, vector<72x256xbf16>
    %cst_93 = arith.constant dense<0.000000e+00> : vector<8x256xf32>
    %100 = tpu.matmul %98, %99, %cst_93 {dimension_numbers = #tpu.dot_dimension_numbers<[1], [0], [0], [1], [0, 0, 1, 1], [], []>} : vector<8x72xbf16>, vector<72x256xbf16>, vector<8x256xf32> -> vector<8x256xf32>
    %c0_94 = arith.constant 0 : index
    %c0_95 = arith.constant 0 : index
    %c0_96 = arith.constant 0 : index
    %101 = vector.load %arg4[%c0_94, %c0_95, %c0_96] : memref<2x8x256xf32, #tpu.memory_space<vmem>>, vector<1x8x256xf32>
    %102 = vector.shape_cast %101 : vector<1x8x256xf32> to vector<8x256xf32>
    %103 = vector.shape_cast %100 : vector<8x256xf32> to vector<1x8x256xf32>
    tpu.vector_store %arg4[%c0_94, %c0_95, %c0_96], %103 {strides = array<i32>} : memref<2x8x256xf32, #tpu.memory_space<vmem>>, vector<1x8x256xf32>,
    %c1_97 = arith.constant 1 : index
    %c0_98 = arith.constant 0 : index
    %c0_99 = arith.constant 0 : index
    %104 = vector.load %arg1[%c1_97, %c0_98, %c0_99] : memref<2x8x256xf32, #tpu.memory_space<vmem>>, vector<1x8x256xf32>
    %105 = vector.shape_cast %104 : vector<1x8x256xf32> to vector<8x256xf32>
    %106 = arith.truncf %105 : vector<8x256xf32> to vector<8x256xbf16>
    %c0_100 = arith.constant 0 : index
    %c17_101 = arith.constant 17 : index
    %107 = vector.load %arg5[%c0_100, %c17_101] : memref<8x290xbf16, #tpu.memory_space<vmem>>, vector<8x256xbf16>
    tpu.vector_store %arg5[%c0_100, %c17_101], %106 {strides = array<i32>} : memref<8x290xbf16, #tpu.memory_space<vmem>>, vector<8x256xbf16>,
    %c0_102 = arith.constant 0 : index
    %c0_103 = arith.constant 0 : index
    %108 = vector.load %arg5[%c0_102, %c0_103] : memref<8x290xbf16, #tpu.memory_space<vmem>>, vector<8x256xbf16>
    %cst_104 = arith.constant 0.000000e+00 : bf16
    %109 = vector.broadcast %cst_104 : bf16 to vector<8x256xbf16>
    %110 = arith.select %20, %108, %109 : vector<8x256xi1>, vector<8x256xbf16>
    %c0_105 = arith.constant 0 : index
    %c0_106 = arith.constant 0 : index
    %111 = vector.load %arg6[%c0_105, %c0_106] : memref<72x256xbf16, #tpu.memory_space<vmem>>, vector<8x256xbf16>
    tpu.vector_store %arg6[%c0_105, %c0_106], %110 {strides = array<i32>} : memref<72x256xbf16, #tpu.memory_space<vmem>>, vector<8x256xbf16>,
    %c0_107 = arith.constant 0 : index
    %c1_108 = arith.constant 1 : index
    %112 = vector.load %arg5[%c0_107, %c1_108] : memref<8x290xbf16, #tpu.memory_space<vmem>>, vector<8x256xbf16>
    %c8_109 = arith.constant 8 : index
    %c0_110 = arith.constant 0 : index
    %113 = vector.load %arg6[%c8_109, %c0_110] : memref<72x256xbf16, #tpu.memory_space<vmem>>, vector<8x256xbf16>
    tpu.vector_store %arg6[%c8_109, %c0_110], %112 {strides = array<i32>} : memref<72x256xbf16, #tpu.memory_space<vmem>>, vector<8x256xbf16>,
    %c0_111 = arith.constant 0 : index
    %c2_112 = arith.constant 2 : index
    %114 = vector.load %arg5[%c0_111, %c2_112] : memref<8x290xbf16, #tpu.memory_space<vmem>>, vector<8x256xbf16>
    %cst_113 = arith.constant 0.000000e+00 : bf16
    %115 = vector.broadcast %cst_113 : bf16 to vector<8x256xbf16>
    %116 = arith.select %24, %114, %115 : vector<8x256xi1>, vector<8x256xbf16>
    %c16_114 = arith.constant 16 : index
    %c0_115 = arith.constant 0 : index
    %117 = vector.load %arg6[%c16_114, %c0_115] : memref<72x256xbf16, #tpu.memory_space<vmem>>, vector<8x256xbf16>
    tpu.vector_store %arg6[%c16_114, %c0_115], %116 {strides = array<i32>} : memref<72x256xbf16, #tpu.memory_space<vmem>>, vector<8x256xbf16>,
    %c0_116 = arith.constant 0 : index
    %c16_117 = arith.constant 16 : index
    %118 = vector.load %arg5[%c0_116, %c16_117] : memref<8x290xbf16, #tpu.memory_space<vmem>>, vector<8x256xbf16>
    %cst_118 = arith.constant 0.000000e+00 : bf16
    %119 = vector.broadcast %cst_118 : bf16 to vector<8x256xbf16>
    %120 = arith.select %20, %118, %119 : vector<8x256xi1>, vector<8x256xbf16>
    %c24_119 = arith.constant 24 : index
    %c0_120 = arith.constant 0 : index
    %121 = vector.load %arg6[%c24_119, %c0_120] : memref<72x256xbf16, #tpu.memory_space<vmem>>, vector<8x256xbf16>
    tpu.vector_store %arg6[%c24_119, %c0_120], %120 {strides = array<i32>} : memref<72x256xbf16, #tpu.memory_space<vmem>>, vector<8x256xbf16>,
    %c0_121 = arith.constant 0 : index
    %c17_122 = arith.constant 17 : index
    %122 = vector.load %arg5[%c0_121, %c17_122] : memref<8x290xbf16, #tpu.memory_space<vmem>>, vector<8x256xbf16>
    %c32_123 = arith.constant 32 : index
    %c0_124 = arith.constant 0 : index
    %123 = vector.load %arg6[%c32_123, %c0_124] : memref<72x256xbf16, #tpu.memory_space<vmem>>, vector<8x256xbf16>
    tpu.vector_store %arg6[%c32_123, %c0_124], %122 {strides = array<i32>} : memref<72x256xbf16, #tpu.memory_space<vmem>>, vector<8x256xbf16>,
    %c0_125 = arith.constant 0 : index
    %c18_126 = arith.constant 18 : index
    %124 = vector.load %arg5[%c0_125, %c18_126] : memref<8x290xbf16, #tpu.memory_space<vmem>>, vector<8x256xbf16>
    %cst_127 = arith.constant 0.000000e+00 : bf16
    %125 = vector.broadcast %cst_127 : bf16 to vector<8x256xbf16>
    %126 = arith.select %24, %124, %125 : vector<8x256xi1>, vector<8x256xbf16>
    %c40_128 = arith.constant 40 : index
    %c0_129 = arith.constant 0 : index
    %127 = vector.load %arg6[%c40_128, %c0_129] : memref<72x256xbf16, #tpu.memory_space<vmem>>, vector<8x256xbf16>
    tpu.vector_store %arg6[%c40_128, %c0_129], %126 {strides = array<i32>} : memref<72x256xbf16, #tpu.memory_space<vmem>>, vector<8x256xbf16>,
    %c0_130 = arith.constant 0 : index
    %c32_131 = arith.constant 32 : index
    %128 = vector.load %arg5[%c0_130, %c32_131] : memref<8x290xbf16, #tpu.memory_space<vmem>>, vector<8x256xbf16>
    %cst_132 = arith.constant 0.000000e+00 : bf16
    %129 = vector.broadcast %cst_132 : bf16 to vector<8x256xbf16>
    %130 = arith.select %20, %128, %129 : vector<8x256xi1>, vector<8x256xbf16>
    %c48_133 = arith.constant 48 : index
    %c0_134 = arith.constant 0 : index
    %131 = vector.load %arg6[%c48_133, %c0_134] : memref<72x256xbf16, #tpu.memory_space<vmem>>, vector<8x256xbf16>
    tpu.vector_store %arg6[%c48_133, %c0_134], %130 {strides = array<i32>} : memref<72x256xbf16, #tpu.memory_space<vmem>>, vector<8x256xbf16>,
    %c0_135 = arith.constant 0 : index
    %c33_136 = arith.constant 33 : index
    %132 = vector.load %arg5[%c0_135, %c33_136] : memref<8x290xbf16, #tpu.memory_space<vmem>>, vector<8x256xbf16>
    %c56_137 = arith.constant 56 : index
    %c0_138 = arith.constant 0 : index
    %133 = vector.load %arg6[%c56_137, %c0_138] : memref<72x256xbf16, #tpu.memory_space<vmem>>, vector<8x256xbf16>
    tpu.vector_store %arg6[%c56_137, %c0_138], %132 {strides = array<i32>} : memref<72x256xbf16, #tpu.memory_space<vmem>>, vector<8x256xbf16>,
    %c0_139 = arith.constant 0 : index
    %c34_140 = arith.constant 34 : index
    %134 = vector.load %arg5[%c0_139, %c34_140] : memref<8x290xbf16, #tpu.memory_space<vmem>>, vector<8x256xbf16>
    %cst_141 = arith.constant 0.000000e+00 : bf16
    %135 = vector.broadcast %cst_141 : bf16 to vector<8x256xbf16>
    %136 = arith.select %24, %134, %135 : vector<8x256xi1>, vector<8x256xbf16>
    %c64_142 = arith.constant 64 : index
    %c0_143 = arith.constant 0 : index
    %137 = vector.load %arg6[%c64_142, %c0_143] : memref<72x256xbf16, #tpu.memory_space<vmem>>, vector<8x256xbf16>
    tpu.vector_store %arg6[%c64_142, %c0_143], %136 {strides = array<i32>} : memref<72x256xbf16, #tpu.memory_space<vmem>>, vector<8x256xbf16>,
    %c0_144 = arith.constant 0 : index
    %c0_145 = arith.constant 0 : index
    %138 = vector.load %arg2[%c0_144, %c0_145] : memref<8x72xbf16, #tpu.memory_space<vmem>>, vector<8x72xbf16>
    %c0_146 = arith.constant 0 : index
    %c0_147 = arith.constant 0 : index
    %139 = vector.load %arg6[%c0_146, %c0_147] : memref<72x256xbf16, #tpu.memory_space<vmem>>, vector<72x256xbf16>
    %cst_148 = arith.constant dense<0.000000e+00> : vector<8x256xf32>
    %140 = tpu.matmul %138, %139, %cst_148 {dimension_numbers = #tpu.dot_dimension_numbers<[1], [0], [0], [1], [0, 0, 1, 1], [], []>} : vector<8x72xbf16>, vector<72x256xbf16>, vector<8x256xf32> -> vector<8x256xf32>
    %141 = arith.truncf %140 : vector<8x256xf32> to vector<8x256xbf16>
    %c0_149 = arith.constant 0 : index
    %c17_150 = arith.constant 17 : index
    %142 = vector.load %arg5[%c0_149, %c17_150] : memref<8x290xbf16, #tpu.memory_space<vmem>>, vector<8x256xbf16>
    tpu.vector_store %arg5[%c0_149, %c17_150], %141 {strides = array<i32>} : memref<8x290xbf16, #tpu.memory_space<vmem>>, vector<8x256xbf16>,
    %c0_151 = arith.constant 0 : index
    %c0_152 = arith.constant 0 : index
    %143 = vector.load %arg5[%c0_151, %c0_152] : memref<8x290xbf16, #tpu.memory_space<vmem>>, vector<8x256xbf16>
    %cst_153 = arith.constant 0.000000e+00 : bf16
    %144 = vector.broadcast %cst_153 : bf16 to vector<8x256xbf16>
    %145 = arith.select %20, %143, %144 : vector<8x256xi1>, vector<8x256xbf16>
    %c0_154 = arith.constant 0 : index
    %c0_155 = arith.constant 0 : index
    %146 = vector.load %arg6[%c0_154, %c0_155] : memref<72x256xbf16, #tpu.memory_space<vmem>>, vector<8x256xbf16>
    tpu.vector_store %arg6[%c0_154, %c0_155], %145 {strides = array<i32>} : memref<72x256xbf16, #tpu.memory_space<vmem>>, vector<8x256xbf16>,
    %c0_156 = arith.constant 0 : index
    %c1_157 = arith.constant 1 : index
    %147 = vector.load %arg5[%c0_156, %c1_157] : memref<8x290xbf16, #tpu.memory_space<vmem>>, vector<8x256xbf16>
    %c8_158 = arith.constant 8 : index
    %c0_159 = arith.constant 0 : index
    %148 = vector.load %arg6[%c8_158, %c0_159] : memref<72x256xbf16, #tpu.memory_space<vmem>>, vector<8x256xbf16>
    tpu.vector_store %arg6[%c8_158, %c0_159], %147 {strides = array<i32>} : memref<72x256xbf16, #tpu.memory_space<vmem>>, vector<8x256xbf16>,
    %c0_160 = arith.constant 0 : index
    %c2_161 = arith.constant 2 : index
    %149 = vector.load %arg5[%c0_160, %c2_161] : memref<8x290xbf16, #tpu.memory_space<vmem>>, vector<8x256xbf16>
    %cst_162 = arith.constant 0.000000e+00 : bf16
    %150 = vector.broadcast %cst_162 : bf16 to vector<8x256xbf16>
    %151 = arith.select %24, %149, %150 : vector<8x256xi1>, vector<8x256xbf16>
    %c16_163 = arith.constant 16 : index
    %c0_164 = arith.constant 0 : index
    %152 = vector.load %arg6[%c16_163, %c0_164] : memref<72x256xbf16, #tpu.memory_space<vmem>>, vector<8x256xbf16>
    tpu.vector_store %arg6[%c16_163, %c0_164], %151 {strides = array<i32>} : memref<72x256xbf16, #tpu.memory_space<vmem>>, vector<8x256xbf16>,
    %c0_165 = arith.constant 0 : index
    %c16_166 = arith.constant 16 : index
    %153 = vector.load %arg5[%c0_165, %c16_166] : memref<8x290xbf16, #tpu.memory_space<vmem>>, vector<8x256xbf16>
    %cst_167 = arith.constant 0.000000e+00 : bf16
    %154 = vector.broadcast %cst_167 : bf16 to vector<8x256xbf16>
    %155 = arith.select %20, %153, %154 : vector<8x256xi1>, vector<8x256xbf16>
    %c24_168 = arith.constant 24 : index
    %c0_169 = arith.constant 0 : index
    %156 = vector.load %arg6[%c24_168, %c0_169] : memref<72x256xbf16, #tpu.memory_space<vmem>>, vector<8x256xbf16>
    tpu.vector_store %arg6[%c24_168, %c0_169], %155 {strides = array<i32>} : memref<72x256xbf16, #tpu.memory_space<vmem>>, vector<8x256xbf16>,
    %c0_170 = arith.constant 0 : index
    %c17_171 = arith.constant 17 : index
    %157 = vector.load %arg5[%c0_170, %c17_171] : memref<8x290xbf16, #tpu.memory_space<vmem>>, vector<8x256xbf16>
    %c32_172 = arith.constant 32 : index
    %c0_173 = arith.constant 0 : index
    %158 = vector.load %arg6[%c32_172, %c0_173] : memref<72x256xbf16, #tpu.memory_space<vmem>>, vector<8x256xbf16>
    tpu.vector_store %arg6[%c32_172, %c0_173], %157 {strides = array<i32>} : memref<72x256xbf16, #tpu.memory_space<vmem>>, vector<8x256xbf16>,
    %c0_174 = arith.constant 0 : index
    %c18_175 = arith.constant 18 : index
    %159 = vector.load %arg5[%c0_174, %c18_175] : memref<8x290xbf16, #tpu.memory_space<vmem>>, vector<8x256xbf16>
    %cst_176 = arith.constant 0.000000e+00 : bf16
    %160 = vector.broadcast %cst_176 : bf16 to vector<8x256xbf16>
    %161 = arith.select %24, %159, %160 : vector<8x256xi1>, vector<8x256xbf16>
    %c40_177 = arith.constant 40 : index
    %c0_178 = arith.constant 0 : index
    %162 = vector.load %arg6[%c40_177, %c0_178] : memref<72x256xbf16, #tpu.memory_space<vmem>>, vector<8x256xbf16>
    tpu.vector_store %arg6[%c40_177, %c0_178], %161 {strides = array<i32>} : memref<72x256xbf16, #tpu.memory_space<vmem>>, vector<8x256xbf16>,
    %c0_179 = arith.constant 0 : index
    %c32_180 = arith.constant 32 : index
    %163 = vector.load %arg5[%c0_179, %c32_180] : memref<8x290xbf16, #tpu.memory_space<vmem>>, vector<8x256xbf16>
    %cst_181 = arith.constant 0.000000e+00 : bf16
    %164 = vector.broadcast %cst_181 : bf16 to vector<8x256xbf16>
    %165 = arith.select %20, %163, %164 : vector<8x256xi1>, vector<8x256xbf16>
    %c48_182 = arith.constant 48 : index
    %c0_183 = arith.constant 0 : index
    %166 = vector.load %arg6[%c48_182, %c0_183] : memref<72x256xbf16, #tpu.memory_space<vmem>>, vector<8x256xbf16>
    tpu.vector_store %arg6[%c48_182, %c0_183], %165 {strides = array<i32>} : memref<72x256xbf16, #tpu.memory_space<vmem>>, vector<8x256xbf16>,
    %c0_184 = arith.constant 0 : index
    %c33_185 = arith.constant 33 : index
    %167 = vector.load %arg5[%c0_184, %c33_185] : memref<8x290xbf16, #tpu.memory_space<vmem>>, vector<8x256xbf16>
    %c56_186 = arith.constant 56 : index
    %c0_187 = arith.constant 0 : index
    %168 = vector.load %arg6[%c56_186, %c0_187] : memref<72x256xbf16, #tpu.memory_space<vmem>>, vector<8x256xbf16>
    tpu.vector_store %arg6[%c56_186, %c0_187], %167 {strides = array<i32>} : memref<72x256xbf16, #tpu.memory_space<vmem>>, vector<8x256xbf16>,
    %c0_188 = arith.constant 0 : index
    %c34_189 = arith.constant 34 : index
    %169 = vector.load %arg5[%c0_188, %c34_189] : memref<8x290xbf16, #tpu.memory_space<vmem>>, vector<8x256xbf16>
    %cst_190 = arith.constant 0.000000e+00 : bf16
    %170 = vector.broadcast %cst_190 : bf16 to vector<8x256xbf16>
    %171 = arith.select %24, %169, %170 : vector<8x256xi1>, vector<8x256xbf16>
    %c64_191 = arith.constant 64 : index
    %c0_192 = arith.constant 0 : index
    %172 = vector.load %arg6[%c64_191, %c0_192] : memref<72x256xbf16, #tpu.memory_space<vmem>>, vector<8x256xbf16>
    tpu.vector_store %arg6[%c64_191, %c0_192], %171 {strides = array<i32>} : memref<72x256xbf16, #tpu.memory_space<vmem>>, vector<8x256xbf16>,
    %c0_193 = arith.constant 0 : index
    %c0_194 = arith.constant 0 : index
    %173 = vector.load %arg3[%c0_193, %c0_194] : memref<8x72xbf16, #tpu.memory_space<vmem>>, vector<8x72xbf16>
    %c0_195 = arith.constant 0 : index
    %c0_196 = arith.constant 0 : index
    %174 = vector.load %arg6[%c0_195, %c0_196] : memref<72x256xbf16, #tpu.memory_space<vmem>>, vector<72x256xbf16>
    %cst_197 = arith.constant dense<0.000000e+00> : vector<8x256xf32>
    %175 = tpu.matmul %173, %174, %cst_197 {dimension_numbers = #tpu.dot_dimension_numbers<[1], [0], [0], [1], [0, 0, 1, 1], [], []>} : vector<8x72xbf16>, vector<72x256xbf16>, vector<8x256xf32> -> vector<8x256xf32>
    %c1_198 = arith.constant 1 : index
    %c0_199 = arith.constant 0 : index
    %c0_200 = arith.constant 0 : index
    %176 = vector.load %arg4[%c1_198, %c0_199, %c0_200] : memref<2x8x256xf32, #tpu.memory_space<vmem>>, vector<1x8x256xf32>
    %177 = vector.shape_cast %176 : vector<1x8x256xf32> to vector<8x256xf32>
    %178 = vector.shape_cast %175 : vector<8x256xf32> to vector<1x8x256xf32>
    tpu.vector_store %arg4[%c1_198, %c0_199, %c0_200], %178 {strides = array<i32>} : memref<2x8x256xf32, #tpu.memory_space<vmem>>, vector<1x8x256xf32>,
    return
  }
  func.func @transform_0(%arg0: i32) -> (i32, i32, i32) {
    %c0_i32 = arith.constant 0 : i32
    %c0_i32_0 = arith.constant 0 : i32
    %c0_i32_1 = arith.constant 0 : i32
    return %arg0, %c0_i32, %c0_i32_0 : i32, i32, i32
  }
  func.func @transform_1(%arg0: i32) -> (i32, i32) {
    %c0_i32 = arith.constant 0 : i32
    %c0_i32_0 = arith.constant 0 : i32
    %c0_i32_1 = arith.constant 0 : i32
    return %c0_i32, %c0_i32_0 : i32, i32
  }
  func.func @transform_2(%arg0: i32) -> (i32, i32) {
    %c0_i32 = arith.constant 0 : i32
    %c0_i32_0 = arith.constant 0 : i32
    %c0_i32_1 = arith.constant 0 : i32
    return %c0_i32, %c0_i32_0 : i32, i32
  }
  func.func @transform_3(%arg0: i32) -> (i32, i32, i32) {
    %c0_i32 = arith.constant 0 : i32
    %c0_i32_0 = arith.constant 0 : i32
    %c0_i32_1 = arith.constant 0 : i32
    return %arg0, %c0_i32, %c0_i32_0 : i32, i32, i32
  }
}

</mosaic_0001>

<bundles_post_ra>
// kernel: csppc_bottleneck.1
= control target key start
LH: loop header
LB: loop body
LE: loop exit
PB: predicated region body
PF: predicated region fallthrough
CT: control target
= control target key end

     0   :  { %v42_v2 = vlaneseq  ;;  %s1327_s16 = smov 17   ;;  %v1328_v9 = vmov 0   ;;  %s1329_s17 = smov 32   ;;  %vm1748_vm6 = vcmask 134144   ;;  %vm83_vm7 = vcmask 273544   ;;  %s1744_s0 = inlined_call_operand.vmem [shape: f32[2,32,256], index: 0, kind: input, shape index: {}, may-alias: {0,3}]   ;;  %s1745_s1 = inlined_call_operand.vmem [shape: bf16[8,72], index: 1, kind: input, shape index: {}]   ;;  %s1746_s2 = inlined_call_operand.vmem [shape: bf16[8,72], index: 2, kind: input, shape index: {}]   ;;  %s1747_s3 = inlined_call_operand.vmem [shape: f32[2,32,256], index: 3, kind: output, shape index: {}, may-alias: {0,3}]  }
   0x1   :  { %v22_v0 = vld [vmem:[%s1744_s0] sm:$0xff]  ;;  %v24_v1 = vld [vmem:[%s1744_s0 + $0x8] sm:$0xff]  ;;  %s1330_s18 = smov 34   ;;  %s1331_s19 = smov 2   ;;  %82 = vst.msk [vmem:[#allocation2] sm:$0xf] %vm1748_vm6, %v1328_v9  ;;  %v1384_v18 = vunpack.c.l.b16 %v1328_v9  ;;  %v1386_v19 = vunpack.c.h.b16 %v1328_v9 }
   0x2   :  { %v87_v3 = vpack.c.bf16 %v24_v1, %v22_v0  ;;  %v43_v4 = vand.u32 127, %v42_v2  ;;  %s1332_s20 = smov 18   ;;  %s1333_s21 = smov 16   ;;  %84 = vst.msk [vmem:[#allocation2 + $0x8] sm:$0xf] %vm83_vm7, %v1328_v9  ;;  %vm96_vm8 = vcmask 1043592  }
   0x3   :  { %vm97_vm9 = vcmask 1047556   ;;  %vm1749_vm10 = vcmask 138240   ;;  %vm252_vm12 = vcmask 261120   ;;  %vm303_vm13 = vcmask 277504   ;;  %s1334_s22 = smov 95   ;;  %s1335_s23 = smov 111  }
   0x4   :  { %89 = vrot.lane.b32.xlu0 %v87_v3, %s1327_s16  ;;  %v44_v5 = vadd.s32 128, %v43_v4  ;;  %v49_v6 = vand.u32 15, %v43_v4  ;;  %vm1376_vm11 = vmor %vm97_vm9, %vm96_vm8  ;;  %vm216_vm7 = vcmask 146432   ;;  %s1336_s24 = smov 126   ;;  %s1337_s25 = smov 96   ;;  %v1770_v50 = vmov 0 }
   0x5   :  { %s1338_s26 = smov 94   ;;  %s1339_s27 = smov 110  }
   0x6   :  { %v56_v7 = vand.u32 15, %v44_v5  ;;  %vm69_vm0 = vcmp.ne.s32.totalorder %v49_v6, 0  ;;  %vm75_vm1 = vcmp.ne.s32.totalorder %v49_v6, 15  ;;  %s1340_s28 = smov 127   ;;  %s1341_s29 = smov 112  }
   0x8   :  { %vm70_vm2 = vcmp.ne.s32.totalorder %v56_v7, 0  ;;  %vm76_vm3 = vcmp.ne.s32.totalorder %v56_v7, 15 }
   0x9   :  { %vm1369_vm4 = vmpackc.low %vm70_vm2, %vm69_vm0 }
   0xa   :  { %v161_v10 = vsel %vm1369_vm4, 65537, %v1328_v9  ;;  %vm123_vm5 = vmpackc.low %vm76_vm3, %vm75_vm1  ;;  %vm128_vm3 = vcmask 15360  }
   0xb   :  { %249 = vrot.lane.b32.xlu1 %v161_v10, %s1329_s17  ;;  %v124_v11 = vsel %vm123_vm5, 65537, %v1328_v9 }
   0xc   :  { %300 = vrot.lane.b32.xlu0 %v124_v11, %s1330_s18  ;;  %125 = vrot.lane.b32.xlu2 %v124_v11, %s1331_s19 }
  0x13   :  { %213 = vrot.lane.b32.xlu1 %v124_v11, %s1332_s20 }
  0x14   :  { %162 = vrot.lane.b32.xlu2 %v161_v10, %s1333_s21 }
  0x66   :  { %v126_v15 = vpop.permute.xlu2 %125 }
  0x67   :  { %v127_v17 = vrot.slane %v126_v15, 4 }
  0x69   :  { %v137_v20 = vunpack.c.l.b16 %v127_v17  ;;  %v138_v21 = vunpack.c.h.b16 %v127_v17  ;;  %v129_v48 = vsel %vm128_vm3, %v127_v17, %v126_v15  ;;  %v561_v17 = vld [vmem:[%s1746_s2] sm:$0xf] }
  0x6a   :  { %v130_v51 = vunpack.c.l.b16 %v129_v48  ;;  %v131_v52 = vunpack.c.h.b16 %v129_v48 }
  0x6b   :  { %vm141_vm14 = vcmp.ne.s32.totalorder %v137_v20, %v1384_v18  ;;  %vm142_vm15 = vcmp.ne.s32.totalorder %v138_v21, %v1386_v19 }
  0x6c   :  { %vm1398_vm2 = vmpackc.low %vm142_vm15, %vm141_vm14 }
  0x6e   :  { %v163_v53 = vpop.permute.xlu2 %162 }
  0x6f   :  { %v164_v61 = vrot.slane %v163_v53, 4 }
  0x71   :  { %v174_v4 = vunpack.c.l.b16 %v164_v61  ;;  %v175_v5 = vunpack.c.h.b16 %v164_v61 }
  0x76   :  { %v90_v12 = vpop.permute.xlu0 %89 }
  0x77   :  { %v91_v14 = vrot.slane %v90_v12, 4 }
  0x79   :  { %v93_v16 = vsel %vm1749_vm10, %v91_v14, %v90_v12  ;;  %100 = vst.msk [vmem:[#allocation2 + $0x8] sm:$0xf] %vm1748_vm6, %v91_v14 }
  0x7a   :  { %99 = vst.msk [vmem:[#allocation2] sm:$0xff] %vm1376_vm11, %v93_v16 }
  0x7d   :  { %v250_v22 = vpop.permute.xlu1 %249 }
  0x7e   :  { %v251_v23 = vrot.slane %v250_v22, 4  ;;  %v301_v24 = vpop.permute.xlu0 %300 }
  0x7f   :  { %v302_v25 = vrot.slane %v301_v24, 4 }
  0x80   :  { %v284_v26 = vld [vmem:[#allocation2 + $0x8] sm:$0xf]  ;;  %v261_v28 = vunpack.c.l.b16 %v251_v23  ;;  %v262_v29 = vunpack.c.h.b16 %v251_v23  ;;  %v253_v31 = vsel %vm252_vm12, %v251_v23, %v250_v22 }
  0x81   :  { %v197_v27 = vld [vmem:[#allocation2 + $0x8] sm:$0xf]  ;;  %289 = vrot.lane.b32.xlu2 %v284_v26, %s1334_s22  ;;  %v1390_v30 = vld [vmem:[#allocation2] sm:$0xff]  ;;  %v304_v32 = vsel %vm303_vm13, %v302_v25, %v301_v24  ;;  %v254_v33 = vunpack.c.l.b16 %v253_v31  ;;  %v255_v34 = vunpack.c.h.b16 %v253_v31  ;;  %v312_v37 = vunpack.c.l.b16 %v302_v25 }
  0x82   :  { %202 = vrot.lane.b32.xlu1 %v197_v27, %s1335_s23  ;;  %200 = vrot.lane.b32.xlu0 %v1390_v30, %s1335_s23  ;;  %vm265_vm0 = vcmp.ne.s32.totalorder %v261_v28, %v1384_v18  ;;  %vm266_vm1 = vcmp.ne.s32.totalorder %v262_v29, %v1386_v19  ;;  %v122_v35 = vld [vmem:[#allocation2 + $0x8] sm:$0xf]  ;;  %v313_v38 = vunpack.c.h.b16 %v302_v25  ;;  %v305_v41 = vunpack.c.l.b16 %v304_v32 }
  0x83   :  { %vm1402_vm5 = vmpackc.low %vm266_vm1, %vm265_vm0  ;;  %v306_v42 = vunpack.c.h.b16 %v304_v32  ;;  %v103_v44 = vsel %vm1369_vm4, %v1390_v30, 0  ;;  %v145_v45 = vsel %vm1398_vm2, %v122_v35, 0  ;;  %v248_v46 = vld [vmem:[#allocation2 + $0x8] sm:$0xf]  ;;  %vm258_vm8 = vcmp.ne.s32.totalorder %v254_v33, %v1384_v18 }
  0x84   :  { %104 = vst [vmem:[#allocation3] sm:$0xff] %v103_v44  ;;  %vm259_vm9 = vcmp.ne.s32.totalorder %v255_v34, %v1386_v19  ;;  %v269_v47 = vsel %vm1402_vm5, %v248_v46, 0  ;;  %vm316_vm12 = vcmp.ne.s32.totalorder %v312_v37, %v1384_v18  ;;  %vm317_vm13 = vcmp.ne.s32.totalorder %v313_v38, %v1386_v19  ;;  %v299_v60 = vld [vmem:[#allocation2 + $0x8] sm:$0xf] }
  0x85   :  { %v214_v39 = vpop.permute.xlu1 %213  ;;  %vm309_vm14 = vcmp.ne.s32.totalorder %v305_v41, %v1384_v18  ;;  %vm310_vm15 = vcmp.ne.s32.totalorder %v306_v42, %v1386_v19  ;;  %vm1425_vm0 = vmpackc.low %vm259_vm9, %vm258_vm8  ;;  %vm135_vm8 = vcmp.ne.s32.totalorder %v131_v52, %v1386_v19  ;;  %vm165_vm9 = vcmask 130048   ;;  %v212_v12 = vld [vmem:[#allocation2 + $0x8] sm:$0xf] }
  0x86   :  { %v215_v43 = vrot.slane %v214_v39, 4  ;;  %v1771_v50 = vsel %vm1425_vm0, 4294967295, %v1770_v50  ;;  %vm1429_vm1 = vmpackc.low %vm317_vm13, %vm316_vm12  ;;  %v268_v62 = vsel %vm1425_vm0, %v1390_v30, 0  ;;  %v166_v1 = vsel %vm165_vm9, %v164_v61, %v163_v53  ;;  %v160_v15 = vld [vmem:[#allocation2 + $0x8] sm:$0xf] }
  0x87   :  { %vm1433_vm3 = vmpackc.low %vm310_vm15, %vm309_vm14  ;;  %v320_v63 = vsel %vm1429_vm1, %v299_v60, 0  ;;  %v167_v7 = vunpack.c.l.b16 %v166_v1  ;;  %v168_v9 = vunpack.c.h.b16 %v166_v1 }
  0x88   :  { %v217_v49 = vsel %vm216_vm7, %v215_v43, %v214_v39  ;;  %v225_v58 = vunpack.c.l.b16 %v215_v43  ;;  %v226_v59 = vunpack.c.h.b16 %v215_v43  ;;  %vm134_vm7 = vcmp.ne.s32.totalorder %v130_v51, %v1384_v18 }
  0x89   :  { %150 = vrot.lane.b32.xlu2 %v145_v45, %s1336_s24  ;;  %v218_v55 = vunpack.c.l.b16 %v217_v49  ;;  %v219_v56 = vunpack.c.h.b16 %v217_v49  ;;  %v319_v0 = vsel %vm1433_vm3, %v1390_v30, 0  ;;  %vm1454_vm6 = vmpackc.low %vm135_vm8, %vm134_vm7  ;;  %vm178_vm7 = vcmp.ne.s32.totalorder %v174_v4, %v1384_v18 }
  0x8a   :  { %287 = vrot.lane.b32.xlu1 %v1390_v30, %s1334_s22  ;;  %274 = vrot.lane.b32.xlu0 %v269_v47, %s1337_s25  ;;  %vm229_vm14 = vcmp.ne.s32.totalorder %v225_v58, %v1384_v18  ;;  %vm230_vm15 = vcmp.ne.s32.totalorder %v226_v59, %v1386_v19  ;;  %v144_v11 = vsel %vm1454_vm6, %v1390_v30, 0  ;;  %vm179_vm8 = vcmp.ne.s32.totalorder %v175_v5, %v1386_v19 }
  0x8b   :  { %vm222_vm12 = vcmp.ne.s32.totalorder %v218_v55, %v1384_v18  ;;  %vm223_vm13 = vcmp.ne.s32.totalorder %v219_v56, %v1386_v19  ;;  %vm1462_vm0 = vmpackc.low %vm230_vm15, %vm229_vm14  ;;  %vm171_vm9 = vcmp.ne.s32.totalorder %v167_v7, %v1384_v18  ;;  %vm1761_vm15 = vcmask 1043456  }
  0x8c   :  { %vm1458_vm10 = vmpackc.low %vm223_vm13, %vm222_vm12  ;;  %v233_v14 = vsel %vm1462_vm0, %v212_v12, 0  ;;  %vm172_vm12 = vcmp.ne.s32.totalorder %v168_v9, %v1386_v19  ;;  %v106_v19 = vld [vmem:[#allocation2 + $0x8] sm:$0xf] }
  0x8d   :  { %v232_v10 = vsel %vm1458_vm10, %v1390_v30, 0  ;;  %vm1481_vm13 = vmpackc.low %vm179_vm8, %vm178_vm7  ;;  %vm1759_vm7 = vcmask 908288   ;;  %vm1752_vm8 = vcmask 777216  }
  0x8e   :  { %vm1485_vm14 = vmpackc.low %vm172_vm12, %vm171_vm9  ;;  %v182_v20 = vsel %vm1481_vm13, %v160_v15, 0  ;;  %vm1753_vm9 = vcmask 785408   ;;  %vm1754_vm12 = vcmask 769024  }
  0x8f   :  { %v181_v18 = vsel %vm1485_vm14, %v1390_v30, 0 }
  0x91   :  { %272 = vrot.lane.b32.xlu2 %v268_v62, %s1337_s25 }
  0x92   :  { %325 = vrot.lane.b32.xlu1 %v320_v63, %s1338_s26  ;;  %323 = vrot.lane.b32.xlu0 %v319_v0, %s1338_s26 }
  0x99   :  { %236 = vrot.lane.b32.xlu2 %v232_v10, %s1339_s27 }
  0x9a   :  { %148 = vrot.lane.b32.xlu1 %v144_v11, %s1336_s24  ;;  %238 = vrot.lane.b32.xlu0 %v233_v14, %s1339_s27 }
  0xa1   :  { %109 = vrot.lane.b32.xlu2 %v1390_v30, %s1340_s28 }
  0xa2   :  { %187 = vrot.lane.b32.xlu1 %v182_v20, %s1341_s29  ;;  %185 = vrot.lane.b32.xlu0 %v181_v18, %s1341_s29 }
  0xaa   :  { %111 = vrot.lane.b32.xlu0 %v106_v19, %s1340_s28 }
  0xdb   :  { %v290_v21 = vpop.permute.xlu2 %289 }
  0xdc   :  { %v292_v31 = vrot.slane %v290_v21, 4 }
  0xe3   :  { %v151_v22 = vpop.permute.xlu2 %150 }
  0xe4   :  { %v153_v52 = vrot.slane %v151_v22, 4 }
  0xeb   :  { %v273_v29 = vpop.permute.xlu2 %272 }
  0xec   :  { %v276_v34 = vrot.slane %v273_v29, 4 }
  0xf3   :  { %v237_v51 = vpop.permute.xlu2 %236 }
  0xf4   :  { %v203_v23 = vpop.permute.xlu1 %202  ;;  %v201_v25 = vpop.permute.xlu0 %200  ;;  %v240_v63 = vrot.slane %v237_v51, 4 }
  0xf5   :  { %v205_v24 = vrot.slane %v203_v23, 4  ;;  %v204_v26 = vrot.slane %v201_v25, 4 }
  0xf7   :  { %v206_v27 = vsel %vm1761_vm15, %v204_v26, %v205_v24 }
  0xf8   :  { %v208_v28 = vsel %vm1759_vm7, %v201_v25, %v206_v27 }
  0xf9   :  { %210 = vst [vmem:[#allocation3 + $0x20] sm:$0xff] %v208_v28 }
  0xfc   :  { %v288_v30 = vpop.permute.xlu1 %287  ;;  %v275_v33 = vpop.permute.xlu0 %274 }
  0xfd   :  { %v291_v32 = vrot.slane %v288_v30, 4  ;;  %v277_v35 = vrot.slane %v275_v33, 4 }
  0xff   :  { %v293_v37 = vsel %vm1761_vm15, %v291_v32, %v292_v31  ;;  %v278_v39 = vsel %vm1761_vm15, %v276_v34, %v277_v35 }
 0x100   :  { %v295_v38 = vsel %vm1752_vm8, %v288_v30, %v293_v37  ;;  %v280_v41 = vsel %vm1753_vm9, %v273_v29, %v278_v39  ;;  %vm1755_vm8 = vcmask 1031168   ;;  %vm1756_vm9 = vcmask 900096   ;;  %v1162_v22 = vld [vmem:[#allocation3 + $0x20] sm:$0xf]  ;;  %v1284_v25 = vld [vmem:[#allocation3 + $0x24] sm:$0xf]  ;;  %v110_v29 = vpop.permute.xlu2 %109 }
 0x101   :  { %297 = vst [vmem:[#allocation3 + $0x38] sm:$0xff] %v295_v38  ;;  %v113_v31 = vrot.slane %v110_v29, 4 }
 0x102   :  { %282 = vst [vmem:[#allocation3 + $0x30] sm:$0xff] %v280_v41 }
 0x104   :  { %v326_v42 = vpop.permute.xlu1 %325  ;;  %v324_v44 = vpop.permute.xlu0 %323 }
 0x105   :  { %v328_v43 = vrot.slane %v326_v42, 4  ;;  %v327_v45 = vrot.slane %v324_v44, 4 }
 0x107   :  { %v329_v46 = vsel %vm1761_vm15, %v327_v45, %v328_v43  ;;  %v1146_v43 = vld [vmem:[#allocation3] sm:$0xf]  ;;  %v1280_v45 = vld [vmem:[#allocation3 + $0x4] sm:$0xf] }
 0x108   :  { %v331_v47 = vsel %vm1754_vm12, %v324_v44, %v329_v46  ;;  %v1287_v58 = vld [vmem:[#allocation3 + $0x34] sm:$0xf0]  ;;  %v1172_v62 = vld [vmem:[#allocation3 + $0x38] sm:$0xf0]  ;;  %vm1758_vm12 = vcmask 916480  }
 0x109   :  { %v369_v48 = vunpack.c.l.b16 %v331_v47  ;;  %v370_v49 = vunpack.c.h.b16 %v331_v47  ;;  %v1170_v61 = vld [vmem:[#allocation3 + $0x30] sm:$0xf]  ;;  %v1286_v5 = vld [vmem:[#allocation3 + $0x34] sm:$0xf] }
 0x10a   :  { %v1171_v12 = vor.u32 %v1287_v58, %v1170_v61  ;;  %v1175_v14 = vor.u32 %v1286_v5, %v1172_v62 }
 0x10b   :  { %v379_v55 = vpack.c.b16 %v369_v48, %v369_v48  ;;  %v380_v56 = vpack.c.b16 %v370_v49, %v370_v49  ;;  %v334_v49 = vld [vmem:[%s1745_s1] sm:$0xf] }
 0x10c   :  { %v149_v53 = vpop.permute.xlu1 %148  ;;  %v239_v60 = vpop.permute.xlu0 %238 }
 0x10d   :  { %v152_v59 = vrot.slane %v149_v53, 4  ;;  %v241_v0 = vrot.slane %v239_v60, 4  ;;  %v395_v1 = vsel %vm1761_vm15, %v379_v55, 0  ;;  %v398_v4 = vsel %vm1761_vm15, %v380_v56, 0 }
 0x10e   :  { %403 = vmatpush.bf16.msra.mxu0 %v395_v1  ;;  %416 = vmatpush.bf16.msra.mxu1 %v398_v4 }
 0x10f   :  { %v154_v7 = vsel %vm1761_vm15, %v152_v59, %v153_v52  ;;  %v242_v10 = vsel %vm1761_vm15, %v240_v63, %v241_v0  ;;  %v28_v52 = vld [vmem:[%s1744_s0 + $0x48] sm:$0xff] }
 0x110   :  { %v156_v9 = vsel %vm1755_vm8, %v149_v53, %v154_v7  ;;  %v244_v11 = vsel %vm1756_vm9, %v237_v51, %v242_v10  ;;  %vm1760_vm8 = vcmask 1039360   ;;  %vm1757_vm9 = vcmask 588800   ;;  %v26_v51 = vld [vmem:[%s1744_s0 + $0x40] sm:$0xff] }
 0x111   :  { %158 = vst [vmem:[#allocation3 + $0x10] sm:$0xff] %v156_v9  ;;  %v656_v53 = vpack.c.bf16 %v28_v52, %v26_v51 }
 0x112   :  { %246 = vst [vmem:[#allocation3 + $0x28] sm:$0xff] %v244_v11  ;;  %404 = vmatpush.bf16.msra.mxu0 %v1171_v12  ;;  %417 = vmatpush.bf16.msra.mxu1 %v1175_v14 }
 0x113   :  { %658 = vrot.lane.b32.xlu2 %v656_v53, %s1327_s16 }
 0x114   :  { %v188_v15 = vpop.permute.xlu1 %187  ;;  %v186_v18 = vpop.permute.xlu0 %185 }
 0x115   :  { %v190_v20 = vrot.slane %v188_v15, 4  ;;  %v189_v19 = vrot.slane %v186_v18, 4 }
 0x117   :  { %v191_v21 = vsel %vm1761_vm15, %v189_v19, %v190_v20 }
 0x118   :  { %v193_v23 = vsel %vm1758_vm12, %v186_v18, %v191_v21  ;;  %v1154_v34 = vld [vmem:[#allocation3 + $0x10] sm:$0xf]  ;;  %v1282_v38 = vld [vmem:[#allocation3 + $0x14] sm:$0xf]  ;;  %vm1787_vm12 = vcmask 134144  }
 0x119   :  { %v1285_v24 = vld [vmem:[#allocation3 + $0x24] sm:$0xf0]  ;;  %v1164_v26 = vld [vmem:[#allocation3 + $0x28] sm:$0xf0]  ;;  %195 = vst [vmem:[#allocation3 + $0x18] sm:$0xff] %v193_v23 }
 0x11a   :  { %v1163_v27 = vor.u32 %v1285_v24, %v1162_v22  ;;  %v1167_v28 = vor.u32 %v1284_v25, %v1164_v26 }
 0x11c   :  { %405 = vmatpush.bf16.msra.mxu0 %v1163_v27  ;;  %418 = vmatpush.bf16.msra.mxu1 %v1167_v28  ;;  %v112_v30 = vpop.permute.xlu0 %111 }
 0x11d   :  { %v114_v32 = vrot.slane %v112_v30, 4 }
 0x11f   :  { %v116_v33 = vsel %vm1761_vm15, %v113_v31, %v114_v32 }
 0x120   :  { %v118_v35 = vsel %vm1760_vm8, %v110_v29, %v116_v33  ;;  %v1283_v37 = vld [vmem:[#allocation3 + $0x14] sm:$0xf0]  ;;  %v1156_v39 = vld [vmem:[#allocation3 + $0x18] sm:$0xf0] }
 0x121   :  { %120 = vst [vmem:[#allocation3 + $0x8] sm:$0xff] %v118_v35  ;;  %v1155_v41 = vor.u32 %v1283_v37, %v1154_v34  ;;  %v1159_v42 = vor.u32 %v1282_v38, %v1156_v39 }
 0x123   :  { %406 = vmatpush.bf16.msra.mxu0 %v1155_v41  ;;  %419 = vmatpush.bf16.msra.mxu1 %v1159_v42 }
 0x128   :  { %v1281_v44 = vld [vmem:[#allocation3 + $0x4] sm:$0xf0]  ;;  %v1148_v46 = vld [vmem:[#allocation3 + $0x8] sm:$0xf0] }
 0x129   :  { %v1147_v47 = vor.u32 %v1281_v44, %v1146_v43  ;;  %v1151_v48 = vor.u32 %v1280_v45, %v1148_v46 }
 0x12b   :  { %407 = vmatpush.bf16.msra.mxu0 %v1147_v47  ;;  %420 = vmatpush.bf16.msra.mxu1 %v1151_v48 }
 0x12e   :  { %1176 = vmatmul.msk.bf16.vlgmr.msra.gmra.mxu0 %vm1757_vm9, %v334_v49  ;;  %1177 = vmatmul.msk.bf16.vlgmr.msra.gmra.mxu1 %vm1757_vm9, %v334_v49  ;;  %vm1786_vm9 = vcmask 138240  }
 0x16d   :  { %v659_v0 = vpop.permute.xlu2 %658 }
 0x16e   :  { %v660_v1 = vrot.slane %v659_v0, 4 }
 0x170   :  { %v661_v14 = vsel %vm1786_vm9, %v660_v1, %v659_v0 }
 0x1ab   :  { %v409_v55 = vpop.f32.mrf.mxu0  ;;  %v422_v56 = vpop.f32.mrf.mxu1 }
 0x1ac   :  { %v426_v58 = vpack.c.bf16 %v422_v56, %v409_v55 }
 0x1ae   :  { %428 = vrot.lane.b32.xlu1 %v426_v58, %s1327_s16 }
 0x1b3   :  { %v411_v59 = vpop.f32.mrf.mxu0  ;;  %v424_v60 = vpop.f32.mrf.mxu1 }
 0x220   :  { %v429_v61 = vpop.permute.xlu1 %428 }
 0x221   :  { %v430_v62 = vrot.slane %v429_v61, 4 }
 0x223   :  { %v431_v63 = vsel %vm1786_vm9, %v430_v62, %v429_v61  ;;  %435 = vst.msk [vmem:[#allocation2 + $0x8] sm:$0xf] %vm1787_vm12, %v430_v62  ;;  %vm1788_vm9 = vnez %v1771_v50 }
 0x224   :  { %434 = vst.msk [vmem:[#allocation2] sm:$0xff] %vm1376_vm11, %v431_v63 }
 0x22a   :  { %v532_v4 = vld [vmem:[#allocation2 + $0x8] sm:$0xf] }
 0x22b   :  { %v486_v5 = vld [vmem:[#allocation2 + $0x8] sm:$0xf]  ;;  %537 = vrot.lane.b32.xlu2 %v532_v4, %s1334_s22  ;;  %v485_v11 = vld [vmem:[#allocation2] sm:$0xff] }
 0x22c   :  { %v546_v7 = vld [vmem:[#allocation2 + $0x8] sm:$0xf]  ;;  %491 = vrot.lane.b32.xlu0 %v486_v5, %s1335_s23  ;;  %v437_v19 = vsel %vm1369_vm4, %v485_v11, 0  ;;  %664 = vst.msk [vmem:[#allocation2] sm:$0xff] %vm1376_vm11, %v661_v14  ;;  %v501_v29 = vsel %vm1458_vm10, %v485_v11, 0  ;;  %v547_v31 = vsel %vm1433_vm3, %v485_v11, 0 }
 0x22d   :  { %v548_v9 = vsel %vm1429_vm1, %v546_v7, 0  ;;  %v440_v10 = vld [vmem:[#allocation2 + $0x8] sm:$0xf]  ;;  %438 = vst [vmem:[#allocation3] sm:$0xff] %v437_v19  ;;  %v517_v32 = vsel %vm1788_vm9, %v485_v11, 0  ;;  %v455_v34 = vsel %vm1454_vm6, %v485_v11, 0 }
 0x22e   :  { %v516_v12 = vld [vmem:[#allocation2 + $0x8] sm:$0xf]  ;;  %553 = vrot.lane.b32.xlu1 %v548_v9, %s1338_s26  ;;  %v471_v35 = vsel %vm1485_vm14, %v485_v11, 0 }
 0x22f   :  { %v500_v15 = vld [vmem:[#allocation2 + $0x8] sm:$0xf]  ;;  %v518_v23 = vsel %vm1402_vm5, %v516_v12, 0 }
 0x230   :  { %v454_v20 = vld [vmem:[#allocation2 + $0x8] sm:$0xf]  ;;  %v502_v24 = vsel %vm1462_vm0, %v500_v15, 0 }
 0x231   :  { %v470_v18 = vld [vmem:[#allocation2 + $0x8] sm:$0xf]  ;;  %v456_v27 = vsel %vm1398_vm2, %v454_v20, 0 }
 0x232   :  { %665 = vst.msk [vmem:[#allocation2 + $0x8] sm:$0xf] %vm1787_vm12, %v660_v1  ;;  %v472_v28 = vsel %vm1481_vm13, %v470_v18, 0  ;;  %vm1789_vm12 = vcmask 777216  }
 0x233   :  { %489 = vrot.lane.b32.xlu2 %v485_v11, %s1335_s23  ;;  %v761_v21 = vld [vmem:[#allocation2] sm:$0xff] }
 0x234   :  { %445 = vrot.lane.b32.xlu0 %v440_v10, %s1340_s28  ;;  %v667_v22 = vsel %vm1369_vm4, %v761_v21, 0  ;;  %v1554_v25 = vld [vmem:[#allocation3] sm:$0xf]  ;;  %v1556_v26 = vld [vmem:[#allocation3 + $0x4] sm:$0xf]  ;;  %v777_v43 = vsel %vm1433_vm3, %v761_v21, 0 }
 0x235   :  { %668 = vst [vmem:[#allocation3] sm:$0xff] %v667_v22  ;;  %v685_v47 = vsel %vm1454_vm6, %v761_v21, 0  ;;  %v747_v48 = vsel %vm1788_vm9, %v761_v21, 0  ;;  %v731_v51 = vsel %vm1458_vm10, %v761_v21, 0  ;;  %v701_v53 = vsel %vm1485_vm14, %v761_v21, 0 }
 0x236   :  { %535 = vrot.lane.b32.xlu1 %v485_v11, %s1334_s22 }
 0x239   :  { %v762_v30 = vld [vmem:[#allocation2 + $0x8] sm:$0xf] }
 0x23a   :  { %v776_v33 = vld [vmem:[#allocation2 + $0x8] sm:$0xf] }
 0x23b   :  { %507 = vrot.lane.b32.xlu2 %v502_v24, %s1339_s27  ;;  %v778_v37 = vsel %vm1429_vm1, %v776_v33, 0  ;;  %v716_v38 = vld [vmem:[#allocation2 + $0x8] sm:$0xf] }
 0x23c   :  { %523 = vrot.lane.b32.xlu0 %v518_v23, %s1337_s25  ;;  %v746_v39 = vld [vmem:[#allocation2 + $0x8] sm:$0xf] }
 0x23d   :  { %v730_v41 = vld [vmem:[#allocation2 + $0x8] sm:$0xf]  ;;  %v748_v42 = vsel %vm1402_vm5, %v746_v39, 0 }
 0x23e   :  { %461 = vrot.lane.b32.xlu1 %v456_v27, %s1336_s24  ;;  %v732_v44 = vsel %vm1462_vm0, %v730_v41, 0  ;;  %v684_v45 = vld [vmem:[#allocation2 + $0x8] sm:$0xf] }
 0x23f   :  { %v686_v46 = vsel %vm1398_vm2, %v684_v45, 0  ;;  %v700_v49 = vld [vmem:[#allocation2 + $0x8] sm:$0xf] }
 0x240   :  { %v702_v52 = vsel %vm1481_vm13, %v700_v49, 0  ;;  %v670_v55 = vld [vmem:[#allocation2 + $0x8] sm:$0xf] }
 0x243   :  { %443 = vrot.lane.b32.xlu2 %v485_v11, %s1340_s28 }
 0x244   :  { %477 = vrot.lane.b32.xlu0 %v472_v28, %s1341_s29 }
 0x246   :  { %505 = vrot.lane.b32.xlu1 %v501_v29, %s1339_s27 }
 0x24b   :  { %521 = vrot.lane.b32.xlu2 %v517_v32, %s1337_s25 }
 0x24c   :  { %551 = vrot.lane.b32.xlu0 %v547_v31, %s1338_s26 }
 0x24e   :  { %767 = vrot.lane.b32.xlu1 %v762_v30, %s1334_s22 }
 0x253   :  { %475 = vrot.lane.b32.xlu2 %v471_v35, %s1341_s29 }
 0x254   :  { %459 = vrot.lane.b32.xlu0 %v455_v34, %s1336_s24 }
 0x256   :  { %783 = vrot.lane.b32.xlu1 %v778_v37, %s1338_s26 }
 0x25b   :  { %721 = vrot.lane.b32.xlu2 %v716_v38, %s1335_s23 }
 0x25c   :  { %765 = vrot.lane.b32.xlu0 %v761_v21, %s1334_s22 }
 0x25e   :  { %719 = vrot.lane.b32.xlu1 %v761_v21, %s1335_s23 }
 0x263   :  { %753 = vrot.lane.b32.xlu2 %v748_v42, %s1337_s25 }
 0x264   :  { %781 = vrot.lane.b32.xlu0 %v777_v43, %s1338_s26 }
 0x266   :  { %737 = vrot.lane.b32.xlu1 %v732_v44, %s1339_s27 }
 0x26b   :  { %689 = vrot.lane.b32.xlu2 %v685_v47, %s1336_s24 }
 0x26c   :  { %691 = vrot.lane.b32.xlu0 %v686_v46, %s1336_s24 }
 0x26e   :  { %751 = vrot.lane.b32.xlu1 %v747_v48, %s1337_s25 }
 0x273   :  { %707 = vrot.lane.b32.xlu2 %v702_v52, %s1341_s29 }
 0x274   :  { %735 = vrot.lane.b32.xlu0 %v731_v51, %s1339_s27 }
 0x276   :  { %705 = vrot.lane.b32.xlu1 %v701_v53, %s1341_s29 }
 0x27c   :  { %673 = vrot.lane.b32.xlu0 %v761_v21, %s1340_s28 }
 0x27e   :  { %675 = vrot.lane.b32.xlu1 %v670_v55, %s1340_s28 }
 0x285   :  { %v538_v56 = vpop.permute.xlu2 %537 }
 0x286   :  { %v540_v11 = vrot.slane %v538_v56, 4 }
 0x28d   :  { %v490_v58 = vpop.permute.xlu2 %489 }
 0x28e   :  { %v493_v61 = vrot.slane %v490_v58, 4 }
 0x295   :  { %v508_v59 = vpop.permute.xlu2 %507 }
 0x296   :  { %v510_v34 = vrot.slane %v508_v59, 4 }
 0x29d   :  { %v444_v0 = vpop.permute.xlu2 %443 }
 0x29e   :  { %v492_v60 = vpop.permute.xlu0 %491  ;;  %v447_v7 = vrot.slane %v444_v0, 4 }
 0x29f   :  { %v494_v62 = vrot.slane %v492_v60, 4 }
 0x2a0   :  { %v554_v63 = vpop.permute.xlu1 %553 }
 0x2a1   :  { %v495_v1 = vsel %vm1761_vm15, %v493_v61, %v494_v62  ;;  %v556_v43 = vrot.slane %v554_v63, 4 }
 0x2a2   :  { %v496_v4 = vsel %vm1759_vm7, %v490_v58, %v495_v1  ;;  %vm1790_vm7 = vcmask 785408  }
 0x2a3   :  { %498 = vst [vmem:[#allocation3 + $0x20] sm:$0xff] %v496_v4 }
 0x2a5   :  { %v522_v20 = vpop.permute.xlu2 %521 }
 0x2a6   :  { %v446_v5 = vpop.permute.xlu0 %445  ;;  %v525_v22 = vrot.slane %v522_v20, 4 }
 0x2a7   :  { %v448_v9 = vrot.slane %v446_v5, 4 }
 0x2a8   :  { %v536_v10 = vpop.permute.xlu1 %535 }
 0x2a9   :  { %v539_v12 = vrot.slane %v536_v10, 4  ;;  %v449_v14 = vsel %vm1761_vm15, %v447_v7, %v448_v9 }
 0x2aa   :  { %v450_v15 = vsel %vm1760_vm8, %v444_v0, %v449_v14  ;;  %vm1792_vm8 = vcmask 900096   ;;  %v1292_v14 = vld [vmem:[#allocation3 + $0x24] sm:$0xf] }
 0x2ab   :  { %v541_v18 = vsel %vm1761_vm15, %v539_v12, %v540_v11  ;;  %452 = vst [vmem:[#allocation3 + $0x8] sm:$0xff] %v450_v15  ;;  %v1196_v12 = vld [vmem:[#allocation3 + $0x20] sm:$0xf] }
 0x2ac   :  { %v542_v19 = vsel %vm1789_vm12, %v536_v10, %v541_v18  ;;  %vm1791_vm12 = vcmask 916480  }
 0x2ad   :  { %544 = vst [vmem:[#allocation3 + $0x38] sm:$0xff] %v542_v19  ;;  %v476_v29 = vpop.permute.xlu2 %475 }
 0x2ae   :  { %v524_v21 = vpop.permute.xlu0 %523  ;;  %v479_v31 = vrot.slane %v476_v29, 4 }
 0x2af   :  { %v526_v23 = vrot.slane %v524_v21, 4 }
 0x2b0   :  { %v462_v24 = vpop.permute.xlu1 %461 }
 0x2b1   :  { %v527_v27 = vsel %vm1761_vm15, %v525_v22, %v526_v23  ;;  %v464_v56 = vrot.slane %v462_v24, 4 }
 0x2b2   :  { %v528_v28 = vsel %vm1790_vm7, %v522_v20, %v527_v27  ;;  %vm1793_vm7 = vcmask 769024  }
 0x2b3   :  { %530 = vst [vmem:[#allocation3 + $0x30] sm:$0xff] %v528_v28 }
 0x2b4   :  { %v1295_v1 = vld [vmem:[#allocation3 + $0x34] sm:$0xf0]  ;;  %v1206_v4 = vld [vmem:[#allocation3 + $0x38] sm:$0xf0] }
 0x2b5   :  { %v722_v58 = vpop.permute.xlu2 %721 }
 0x2b6   :  { %v478_v30 = vpop.permute.xlu0 %477  ;;  %v724_v23 = vrot.slane %v722_v58, 4 }
 0x2b7   :  { %v480_v32 = vrot.slane %v478_v30, 4 }
 0x2b8   :  { %v506_v33 = vpop.permute.xlu1 %505 }
 0x2b9   :  { %v509_v35 = vrot.slane %v506_v33, 4  ;;  %v481_v37 = vsel %vm1761_vm15, %v479_v31, %v480_v32 }
 0x2ba   :  { %v482_v38 = vsel %vm1791_vm12, %v476_v29, %v481_v37  ;;  %v1204_v55 = vld [vmem:[#allocation3 + $0x30] sm:$0xf]  ;;  %v1294_v63 = vld [vmem:[#allocation3 + $0x34] sm:$0xf]  ;;  %vm1795_vm12 = vcmask 777216  }
 0x2bb   :  { %v511_v39 = vsel %vm1761_vm15, %v509_v35, %v510_v34  ;;  %484 = vst [vmem:[#allocation3 + $0x18] sm:$0xff] %v482_v38  ;;  %v1205_v7 = vor.u32 %v1295_v1, %v1204_v55  ;;  %v1209_v9 = vor.u32 %v1294_v63, %v1206_v4 }
 0x2bc   :  { %v512_v41 = vsel %vm1792_vm8, %v506_v33, %v511_v39  ;;  %vm1794_vm8 = vcmask 1031168   ;;  %v1289_v39 = vld [vmem:[#allocation3 + $0x4] sm:$0xf0] }
 0x2bd   :  { %514 = vst [vmem:[#allocation3 + $0x28] sm:$0xff] %v512_v41  ;;  %v754_v27 = vpop.permute.xlu2 %753  ;;  %v1182_v41 = vld [vmem:[#allocation3 + $0x8] sm:$0xf0] }
 0x2be   :  { %v552_v42 = vpop.permute.xlu0 %551 }
 0x2bf   :  { %v555_v44 = vrot.slane %v552_v42, 4 }
 0x2c0   :  { %v768_v45 = vpop.permute.xlu1 %767 }
 0x2c1   :  { %v557_v46 = vsel %vm1761_vm15, %v555_v44, %v556_v43  ;;  %v770_v19 = vrot.slane %v768_v45, 4 }
 0x2c2   :  { %v558_v47 = vsel %vm1793_vm7, %v552_v42, %v557_v46  ;;  %v1291_v29 = vld [vmem:[#allocation3 + $0x14] sm:$0xf0]  ;;  %v1190_v34 = vld [vmem:[#allocation3 + $0x18] sm:$0xf0]  ;;  %vm1796_vm7 = vcmask 908288   ;;  %v1181_v46 = vor.u32 %v1289_v39, %v1554_v25 }
 0x2c3   :  { %v596_v48 = vunpack.c.l.b16 %v558_v47  ;;  %v597_v49 = vunpack.c.h.b16 %v558_v47  ;;  %v1185_v47 = vor.u32 %v1556_v26, %v1182_v41  ;;  %v756_v26 = vrot.slane %v754_v27, 4 }
 0x2c4   :  { %v1293_v10 = vld [vmem:[#allocation3 + $0x24] sm:$0xf0]  ;;  %v1198_v11 = vld [vmem:[#allocation3 + $0x28] sm:$0xf0] }
 0x2c5   :  { %v606_v51 = vpack.c.b16 %v596_v48, %v596_v48  ;;  %v607_v52 = vpack.c.b16 %v597_v49, %v597_v49  ;;  %v1197_v20 = vor.u32 %v1293_v10, %v1196_v12  ;;  %v1201_v18 = vor.u32 %v1292_v14, %v1198_v11 }
 0x2c6   :  { %v460_v53 = vpop.permute.xlu0 %459 }
 0x2c7   :  { %v463_v59 = vrot.slane %v460_v53, 4  ;;  %v620_v61 = vsel %vm1761_vm15, %v606_v51, 0  ;;  %v623_v62 = vsel %vm1761_vm15, %v607_v52, 0  ;;  %v690_v51 = vpop.permute.xlu2 %689 }
 0x2c8   :  { %v784_v60 = vpop.permute.xlu1 %783  ;;  %628 = vmatpush.bf16.msra.mxu2 %v620_v61  ;;  %641 = vmatpush.bf16.msra.mxu3 %v623_v62 }
 0x2c9   :  { %v465_v0 = vsel %vm1761_vm15, %v463_v59, %v464_v56  ;;  %v786_v43 = vrot.slane %v784_v60, 4  ;;  %v693_v59 = vrot.slane %v690_v51, 4 }
 0x2ca   :  { %v466_v5 = vsel %vm1794_vm8, %v460_v53, %v465_v0  ;;  %vm1797_vm8 = vcmask 769024  }
 0x2cb   :  { %468 = vst [vmem:[#allocation3 + $0x10] sm:$0xff] %v466_v5 }
 0x2cc   :  { %629 = vmatpush.bf16.msra.mxu2 %v1205_v7  ;;  %642 = vmatpush.bf16.msra.mxu3 %v1209_v9 }
 0x2ce   :  { %v766_v15 = vpop.permute.xlu0 %765 }
 0x2cf   :  { %v769_v21 = vrot.slane %v766_v15, 4  ;;  %v708_v7 = vpop.permute.xlu2 %707 }
 0x2d0   :  { %v720_v22 = vpop.permute.xlu1 %719  ;;  %630 = vmatpush.bf16.msra.mxu2 %v1197_v20  ;;  %643 = vmatpush.bf16.msra.mxu3 %v1201_v18  ;;  %v710_v14 = vrot.slane %v708_v7, 4 }
 0x2d1   :  { %v723_v24 = vrot.slane %v720_v22, 4  ;;  %v771_v28 = vsel %vm1761_vm15, %v769_v21, %v770_v19 }
 0x2d2   :  { %v772_v30 = vsel %vm1795_vm12, %v766_v15, %v771_v28  ;;  %v1188_v32 = vld [vmem:[#allocation3 + $0x10] sm:$0xf]  ;;  %v1290_v33 = vld [vmem:[#allocation3 + $0x14] sm:$0xf]  ;;  %vm1798_vm12 = vcmask 1031168  }
 0x2d3   :  { %v725_v31 = vsel %vm1761_vm15, %v723_v24, %v724_v23  ;;  %774 = vst [vmem:[#allocation3 + $0x38] sm:$0xff] %v772_v30  ;;  %v1189_v37 = vor.u32 %v1291_v29, %v1188_v32  ;;  %v1193_v38 = vor.u32 %v1290_v33, %v1190_v34 }
 0x2d4   :  { %v726_v35 = vsel %vm1796_vm7, %v720_v22, %v725_v31  ;;  %vm1799_vm7 = vcmask 785408  }
 0x2d5   :  { %728 = vst [vmem:[#allocation3 + $0x20] sm:$0xff] %v726_v35  ;;  %631 = vmatpush.bf16.msra.mxu2 %v1189_v37  ;;  %644 = vmatpush.bf16.msra.mxu3 %v1193_v38 }
 0x2d6   :  { %v782_v42 = vpop.permute.xlu0 %781 }
 0x2d7   :  { %v785_v44 = vrot.slane %v782_v42, 4 }
 0x2d8   :  { %v738_v45 = vpop.permute.xlu1 %737 }
 0x2d9   :  { %v787_v48 = vsel %vm1761_vm15, %v785_v44, %v786_v43  ;;  %632 = vmatpush.bf16.msra.mxu2 %v1181_v46  ;;  %645 = vmatpush.bf16.msra.mxu3 %v1185_v47  ;;  %v740_v10 = vrot.slane %v738_v45, 4 }
 0x2da   :  { %v788_v49 = vsel %vm1797_vm8, %v782_v42, %v787_v48  ;;  %vm1800_vm8 = vcmask 900096   ;;  %v1303_v21 = vld [vmem:[#allocation3 + $0x34] sm:$0xf0]  ;;  %v1240_v22 = vld [vmem:[#allocation3 + $0x38] sm:$0xf0] }
 0x2db   :  { %v826_v52 = vunpack.c.l.b16 %v788_v49  ;;  %v827_v53 = vunpack.c.h.b16 %v788_v49 }
 0x2dc   :  { %v1230_v34 = vld [vmem:[#allocation3 + $0x20] sm:$0xf]  ;;  %v1300_v38 = vld [vmem:[#allocation3 + $0x24] sm:$0xf] }
 0x2dd   :  { %v836_v55 = vpack.c.b16 %v826_v52, %v826_v52  ;;  %v837_v56 = vpack.c.b16 %v827_v53, %v827_v53  ;;  %v1296_v53 = vld [vmem:[#allocation3 + $0x4] sm:$0xf] }
 0x2de   :  { %v692_v58 = vpop.permute.xlu0 %691 }
 0x2df   :  { %v694_v60 = vrot.slane %v692_v58, 4  ;;  %v850_v62 = vsel %vm1761_vm15, %v836_v55, 0  ;;  %v853_v25 = vsel %vm1761_vm15, %v837_v56, 0 }
 0x2e0   :  { %v752_v61 = vpop.permute.xlu1 %751  ;;  %858 = vmatpush.bf16.msrb.mxu0 %v850_v62  ;;  %871 = vmatpush.bf16.msrb.mxu1 %v853_v25 }
 0x2e1   :  { %v755_v63 = vrot.slane %v752_v61, 4  ;;  %v695_v0 = vsel %vm1761_vm15, %v693_v59, %v694_v60  ;;  %v791_v59 = vld [vmem:[%s1745_s1] sm:$0xf] }
 0x2e2   :  { %v696_v1 = vsel %vm1798_vm12, %v690_v51, %v695_v0  ;;  %vm1801_vm12 = vcmask 916480   ;;  %v1214_v51 = vld [vmem:[#allocation3] sm:$0xf] }
 0x2e3   :  { %v757_v4 = vsel %vm1761_vm15, %v755_v63, %v756_v26  ;;  %698 = vst [vmem:[#allocation3 + $0x10] sm:$0xff] %v696_v1 }
 0x2e4   :  { %v758_v5 = vsel %vm1799_vm7, %v752_v61, %v757_v4  ;;  %vm1802_vm7 = vcmask 1039360  }
 0x2e5   :  { %760 = vst [vmem:[#allocation3 + $0x30] sm:$0xff] %v758_v5 }
 0x2e6   :  { %v736_v9 = vpop.permute.xlu0 %735 }
 0x2e7   :  { %v739_v11 = vrot.slane %v736_v9, 4 }
 0x2e8   :  { %v706_v12 = vpop.permute.xlu1 %705 }
 0x2e9   :  { %v709_v15 = vrot.slane %v706_v12, 4  ;;  %v741_v20 = vsel %vm1761_vm15, %v739_v11, %v740_v10 }
 0x2ea   :  { %v742_v18 = vsel %vm1800_vm8, %v736_v9, %v741_v20  ;;  %v1222_v46 = vld [vmem:[#allocation3 + $0x10] sm:$0xf]  ;;  %v1298_v47 = vld [vmem:[#allocation3 + $0x14] sm:$0xf]  ;;  %vm1803_vm8 = vcmask 588800  }
 0x2eb   :  { %v711_v19 = vsel %vm1761_vm15, %v709_v15, %v710_v14  ;;  %744 = vst [vmem:[#allocation3 + $0x28] sm:$0xff] %v742_v18 }
 0x2ec   :  { %v712_v23 = vsel %vm1801_vm12, %v706_v12, %v711_v19  ;;  %v1238_v24 = vld [vmem:[#allocation3 + $0x30] sm:$0xf]  ;;  %v1302_v27 = vld [vmem:[#allocation3 + $0x34] sm:$0xf]  ;;  %vm1804_vm12 = vmmov %vm1803_vm8 }
 0x2ed   :  { %714 = vst [vmem:[#allocation3 + $0x18] sm:$0xff] %v712_v23  ;;  %v1239_v28 = vor.u32 %v1303_v21, %v1238_v24  ;;  %v1243_v29 = vor.u32 %v1302_v27, %v1240_v22 }
 0x2ee   :  { %v674_v30 = vpop.permute.xlu0 %673 }
 0x2ef   :  { %859 = vmatpush.bf16.msrb.mxu0 %v1239_v28  ;;  %872 = vmatpush.bf16.msrb.mxu1 %v1243_v29  ;;  %v677_v31 = vrot.slane %v674_v30, 4 }
 0x2f0   :  { %v676_v32 = vpop.permute.xlu1 %675 }
 0x2f1   :  { %v678_v33 = vrot.slane %v676_v32, 4 }
 0x2f2   :  { %v1301_v37 = vld [vmem:[#allocation3 + $0x24] sm:$0xf0]  ;;  %v1232_v39 = vld [vmem:[#allocation3 + $0x28] sm:$0xf0] }
 0x2f3   :  { %v679_v35 = vsel %vm1761_vm15, %v677_v31, %v678_v33  ;;  %v1231_v42 = vor.u32 %v1301_v37, %v1230_v34  ;;  %v1235_v43 = vor.u32 %v1300_v38, %v1232_v39  ;;  %vm1806_vm15 = vcmask 134144  }
 0x2f4   :  { %v680_v41 = vsel %vm1802_vm7, %v674_v30, %v679_v35  ;;  %v1299_v44 = vld [vmem:[#allocation3 + $0x14] sm:$0xf0]  ;;  %v1224_v45 = vld [vmem:[#allocation3 + $0x18] sm:$0xf0]  ;;  %vm1805_vm7 = vcmask 138240  }
 0x2f5   :  { %682 = vst [vmem:[#allocation3 + $0x8] sm:$0xff] %v680_v41  ;;  %860 = vmatpush.bf16.msrb.mxu0 %v1231_v42  ;;  %873 = vmatpush.bf16.msrb.mxu1 %v1235_v43  ;;  %v1223_v48 = vor.u32 %v1299_v44, %v1222_v46  ;;  %v1227_v49 = vor.u32 %v1298_v47, %v1224_v45 }
 0x2f9   :  { %861 = vmatpush.bf16.msrb.mxu0 %v1223_v48  ;;  %874 = vmatpush.bf16.msrb.mxu1 %v1227_v49 }
 0x2fc   :  { %v1297_v52 = vld [vmem:[#allocation3 + $0x4] sm:$0xf0]  ;;  %v1216_v55 = vld [vmem:[#allocation3 + $0x8] sm:$0xf0] }
 0x2fd   :  { %v1215_v56 = vor.u32 %v1297_v52, %v1214_v51  ;;  %v1219_v58 = vor.u32 %v1296_v53, %v1216_v55 }
 0x2ff   :  { %862 = vmatpush.bf16.msrb.mxu0 %v1215_v56  ;;  %875 = vmatpush.bf16.msrb.mxu1 %v1219_v58 }
 0x302   :  { %1244 = vmatmul.msk.bf16.vlgmr.msrb.gmra.mxu0 %vm1803_vm8, %v791_v59  ;;  %1245 = vmatmul.msk.bf16.vlgmr.msrb.gmra.mxu1 %vm1804_vm12, %v791_v59 }
 0x37f   :  { %v864_v60 = vpop.f32.mrf.mxu0  ;;  %v877_v61 = vpop.f32.mrf.mxu1 }
 0x380   :  { %v881_v62 = vpack.c.bf16 %v877_v61, %v864_v60 }
 0x382   :  { %883 = vrot.lane.b32.xlu2 %v881_v62, %s1327_s16 }
 0x387   :  { %v866_v25 = vpop.f32.mrf.mxu0  ;;  %v879_v26 = vpop.f32.mrf.mxu1 }
 0x3dc   :  { %v884_v63 = vpop.permute.xlu2 %883 }
 0x3dd   :  { %v885_v0 = vrot.slane %v884_v63, 4 }
 0x3df   :  { %v886_v1 = vsel %vm1805_vm7, %v885_v0, %v884_v63  ;;  %890 = vst.msk [vmem:[#allocation2 + $0x8] sm:$0xf] %vm1806_vm15, %v885_v0  ;;  %vm1822_vm7 = vcmask 900096  }
 0x3e0   :  { %889 = vst.msk [vmem:[#allocation2] sm:$0xff] %vm1376_vm11, %v886_v1  ;;  %vm1810_vm11 = vmmov %vm1803_vm8 }
 0x3e1   :  { %1211 = vmatmul.msk.bf16.vlgmr.msra.gmra.mxu3 %vm1810_vm11, %v561_v17  ;;  %vm1826_vm11 = vcmask 1039360  }
 0x3e6   :  { %v987_v4 = vld [vmem:[#allocation2 + $0x8] sm:$0xf] }
 0x3e7   :  { %v941_v5 = vld [vmem:[#allocation2 + $0x8] sm:$0xf]  ;;  %992 = vrot.lane.b32.xlu2 %v987_v4, %s1334_s22  ;;  %v940_v10 = vld [vmem:[#allocation2] sm:$0xff] }
 0x3e8   :  { %v971_v7 = vld [vmem:[#allocation2 + $0x8] sm:$0xf]  ;;  %946 = vrot.lane.b32.xlu1 %v941_v5, %s1335_s23  ;;  %v892_v11 = vsel %vm1369_vm4, %v940_v10, 0  ;;  %v972_v40 = vsel %vm1788_vm9, %v940_v10, 0  ;;  %v1002_v8 = vsel %vm1433_vm3, %v940_v10, 0  ;;  %v956_v54 = vsel %vm1458_vm10, %v940_v10, 0  ;;  %vm1809_vm10 = vmmov %vm1803_vm8 }
 0x3e9   :  { %v973_v9 = vsel %vm1402_vm5, %v971_v7, 0  ;;  %v1001_v12 = vld [vmem:[#allocation2 + $0x8] sm:$0xf]  ;;  %893 = vst [vmem:[#allocation3] sm:$0xff] %v892_v11  ;;  %v910_v20 = vsel %vm1454_vm6, %v940_v10, 0  ;;  %v926_v2 = vsel %vm1485_vm14, %v940_v10, 0  ;;  %1210 = vmatmul.msk.bf16.vlgmr.msra.gmra.mxu2 %vm1809_vm10, %v561_v17 }
 0x3ea   :  { %978 = vrot.lane.b32.xlu0 %v973_v9, %s1337_s25  ;;  %v909_v14 = vld [vmem:[#allocation2 + $0x8] sm:$0xf]  ;;  %v1003_v13 = vsel %vm1429_vm1, %v1001_v12, 0  ;;  %vm1807_vm4 = vcmask 1043456   ;;  %vm1808_vm6 = vcmask 785408   ;;  %vm1812_vm5 = vcmask 908288  }
 0x3eb   :  { %v911_v15 = vsel %vm1398_vm2, %v909_v14, 0  ;;  %v955_v36 = vld [vmem:[#allocation2 + $0x8] sm:$0xf]  ;;  %vm1811_vm2 = vmmov %vm1807_vm4  ;;  %vm1814_vm1 = vcmask 777216   ;;  %vm1820_vm8 = vcmask 1031168  }
 0x3ec   :  { %v957_v50 = vsel %vm1462_vm0, %v955_v36, 0  ;;  %v925_v57 = vld [vmem:[#allocation2 + $0x8] sm:$0xf]  ;;  %vm1813_vm0 = vmmov %vm1811_vm2 }
 0x3ed   :  { %v927_v18 = vsel %vm1481_vm13, %v925_v57, 0  ;;  %v895_v3 = vld [vmem:[#allocation2 + $0x8] sm:$0xf]  ;;  %vm1815_vm3 = vmmov %vm1813_vm0  ;;  %vm1816_vm13 = vcmask 769024  }
 0x3ee   :  { %vm1817_vm14 = vmmov %vm1813_vm0 }
 0x3ef   :  { %916 = vrot.lane.b32.xlu2 %v911_v15, %s1336_s24  ;;  %vm1818_vm15 = vmmov %vm1813_vm0 }
 0x3f0   :  { %1008 = vrot.lane.b32.xlu1 %v1003_v13, %s1338_s26  ;;  %vm1819_vm9 = vmmov %vm1813_vm0  ;;  %v1248_v17 = vld [vmem:[#allocation3] sm:$0xf] }
 0x3f1   :  { %vm1821_vm12 = vmmov %vm1813_vm0 }
 0x3f2   :  { %944 = vrot.lane.b32.xlu0 %v940_v10, %s1335_s23  ;;  %vm1825_vm10 = vmmov %vm1813_vm0 }
 0x3f7   :  { %976 = vrot.lane.b32.xlu2 %v972_v40, %s1337_s25 }
 0x3f8   :  { %990 = vrot.lane.b32.xlu1 %v940_v10, %s1334_s22 }
 0x3fa   :  { %1006 = vrot.lane.b32.xlu0 %v1002_v8, %s1338_s26 }
 0x3ff   :  { %960 = vrot.lane.b32.xlu2 %v956_v54, %s1339_s27 }
 0x400   :  { %914 = vrot.lane.b32.xlu1 %v910_v20, %s1336_s24 }
 0x402   :  { %962 = vrot.lane.b32.xlu0 %v957_v50, %s1339_s27 }
 0x407   :  { %898 = vrot.lane.b32.xlu2 %v940_v10, %s1340_s28 }
 0x408   :  { %932 = vrot.lane.b32.xlu1 %v927_v18, %s1341_s29 }
 0x40a   :  { %930 = vrot.lane.b32.xlu0 %v926_v2, %s1341_s29 }
 0x412   :  { %900 = vrot.lane.b32.xlu0 %v895_v3, %s1340_s28 }
 0x441   :  { %v993_v6 = vpop.permute.xlu2 %992 }
 0x442   :  { %v995_v37 = vrot.slane %v993_v6, 4 }
 0x449   :  { %v917_v19 = vpop.permute.xlu2 %916 }
 0x44a   :  { %v919_v55 = vrot.slane %v917_v19, 4 }
 0x451   :  { %v977_v21 = vpop.permute.xlu2 %976 }
 0x452   :  { %v980_v24 = vrot.slane %v977_v21, 4 }
 0x459   :  { %v961_v49 = vpop.permute.xlu2 %960 }
 0x45a   :  { %v947_v22 = vpop.permute.xlu1 %946  ;;  %v964_v59 = vrot.slane %v961_v49, 4 }
 0x45b   :  { %v949_v31 = vrot.slane %v947_v22, 4 }
 0x45c   :  { %v979_v23 = vpop.permute.xlu0 %978 }
 0x45d   :  { %v981_v16 = vrot.slane %v979_v23, 4 }
 0x45f   :  { %v982_v27 = vsel %vm1807_vm4, %v980_v24, %v981_v16  ;;  %vm1823_vm4 = vmmov %vm1813_vm0 }
 0x460   :  { %v983_v28 = vsel %vm1808_vm6, %v977_v21, %v982_v27  ;;  %vm1824_vm6 = vcmask 916480  }
 0x461   :  { %985 = vst [vmem:[#allocation3 + $0x30] sm:$0xff] %v983_v28  ;;  %v899_v18 = vpop.permute.xlu2 %898 }
 0x462   :  { %v1009_v29 = vpop.permute.xlu1 %1008  ;;  %v902_v3 = vrot.slane %v899_v18, 4 }
 0x463   :  { %v1011_v41 = vrot.slane %v1009_v29, 4 }
 0x464   :  { %v945_v30 = vpop.permute.xlu0 %944 }
 0x465   :  { %v948_v32 = vrot.slane %v945_v30, 4 }
 0x467   :  { %v950_v33 = vsel %vm1811_vm2, %v948_v32, %v949_v31  ;;  %vm1827_vm2 = vcmask 588800  }
 0x468   :  { %v951_v34 = vsel %vm1812_vm5, %v945_v30, %v950_v33  ;;  %v1272_v26 = vld [vmem:[#allocation3 + $0x30] sm:$0xf]  ;;  %v1310_v4 = vld [vmem:[#allocation3 + $0x34] sm:$0xf]  ;;  %v1304_v30 = vld [vmem:[#allocation3 + $0x4] sm:$0xf] }
 0x469   :  { %953 = vst [vmem:[#allocation3 + $0x20] sm:$0xff] %v951_v34  ;;  %v1016_v34 = vld [vmem:[%s1746_s2] sm:$0xf]  ;;  %vm1828_vm5 = vmmov %vm1827_vm2 }
 0x46a   :  { %v991_v35 = vpop.permute.xlu1 %990 }
 0x46b   :  { %v994_v38 = vrot.slane %v991_v35, 4 }
 0x46c   :  { %v1007_v39 = vpop.permute.xlu0 %1006 }
 0x46d   :  { %v1010_v42 = vrot.slane %v1007_v39, 4  ;;  %v996_v43 = vsel %vm1813_vm0, %v994_v38, %v995_v37  ;;  %v647_v37 = vpop.f32.mrf.mxu3 }
 0x46e   :  { %v997_v44 = vsel %vm1814_vm1, %v991_v35, %v996_v43  ;;  %v634_v35 = vpop.f32.mrf.mxu2  ;;  %1126 = vst [vmem:[%s1747_s3 + $0x8] sm:$0xff] %v647_v37 }
 0x46f   :  { %v1012_v45 = vsel %vm1815_vm3, %v1010_v42, %v1011_v41  ;;  %999 = vst [vmem:[#allocation3 + $0x38] sm:$0xff] %v997_v44 }
 0x470   :  { %v1013_v46 = vsel %vm1816_vm13, %v1007_v39, %v1012_v45  ;;  %v1264_v40 = vld [vmem:[#allocation3 + $0x20] sm:$0xf]  ;;  %v1308_v54 = vld [vmem:[#allocation3 + $0x24] sm:$0xf]  ;;  %1124 = vst [vmem:[%s1747_s3] sm:$0xff] %v634_v35 }
 0x471   :  { %v1051_v47 = vunpack.c.l.b16 %v1013_v46  ;;  %v1052_v48 = vunpack.c.h.b16 %v1013_v46 }
 0x472   :  { %v915_v51 = vpop.permute.xlu1 %914 }
 0x473   :  { %v1061_v52 = vpack.c.b16 %v1051_v47, %v1051_v47  ;;  %v1062_v53 = vpack.c.b16 %v1052_v48, %v1052_v48  ;;  %v918_v56 = vrot.slane %v915_v51, 4 }
 0x474   :  { %v963_v58 = vpop.permute.xlu0 %962 }
 0x475   :  { %v965_v60 = vrot.slane %v963_v58, 4  ;;  %v1075_v61 = vsel %vm1817_vm14, %v1061_v52, 0  ;;  %v1078_v62 = vsel %vm1818_vm15, %v1062_v53, 0  ;;  %v920_v25 = vsel %vm1819_vm9, %v918_v56, %v919_v55  ;;  %v649_v39 = vpop.f32.mrf.mxu3 }
 0x476   :  { %1083 = vmatpush.bf16.msrb.mxu2 %v1075_v61  ;;  %1096 = vmatpush.bf16.msrb.mxu3 %v1078_v62  ;;  %v921_v63 = vsel %vm1820_vm8, %v915_v51, %v920_v25  ;;  %v1311_v1 = vld [vmem:[#allocation3 + $0x34] sm:$0xf0]  ;;  %v1274_v5 = vld [vmem:[#allocation3 + $0x38] sm:$0xf0]  ;;  %v636_v38 = vpop.f32.mrf.mxu2 }
 0x477   :  { %v966_v0 = vsel %vm1821_vm12, %v964_v59, %v965_v60  ;;  %923 = vst [vmem:[#allocation3 + $0x10] sm:$0xff] %v921_v63  ;;  %v1273_v9 = vor.u32 %v1311_v1, %v1272_v26  ;;  %v1277_v10 = vor.u32 %v1310_v4, %v1274_v5 }
 0x478   :  { %v967_v7 = vsel %vm1822_vm7, %v961_v49, %v966_v0 }
 0x479   :  { %969 = vst [vmem:[#allocation3 + $0x28] sm:$0xff] %v967_v7 }
 0x47a   :  { %1084 = vmatpush.bf16.msrb.mxu2 %v1273_v9  ;;  %1097 = vmatpush.bf16.msrb.mxu3 %v1277_v10  ;;  %v933_v11 = vpop.permute.xlu1 %932 }
 0x47b   :  { %v935_v12 = vrot.slane %v933_v11, 4 }
 0x47c   :  { %v931_v14 = vpop.permute.xlu0 %930 }
 0x47d   :  { %v934_v13 = vrot.slane %v931_v14, 4 }
 0x47e   :  { %v1256_v21 = vld [vmem:[#allocation3 + $0x10] sm:$0xf]  ;;  %v1306_v24 = vld [vmem:[#allocation3 + $0x14] sm:$0xf] }
 0x47f   :  { %v936_v15 = vsel %vm1823_vm4, %v934_v13, %v935_v12 }
 0x480   :  { %v937_v8 = vsel %vm1824_vm6, %v931_v14, %v936_v15  ;;  %v1309_v36 = vld [vmem:[#allocation3 + $0x24] sm:$0xf0]  ;;  %v1266_v20 = vld [vmem:[#allocation3 + $0x28] sm:$0xf0] }
 0x481   :  { %939 = vst [vmem:[#allocation3 + $0x18] sm:$0xff] %v937_v8  ;;  %v1265_v50 = vor.u32 %v1309_v36, %v1264_v40  ;;  %v1269_v57 = vor.u32 %v1308_v54, %v1266_v20 }
 0x483   :  { %1085 = vmatpush.bf16.msrb.mxu2 %v1265_v50  ;;  %1098 = vmatpush.bf16.msrb.mxu3 %v1269_v57 }
 0x484   :  { %v901_v2 = vpop.permute.xlu0 %900 }
 0x485   :  { %v903_v6 = vrot.slane %v901_v2, 4 }
 0x487   :  { %v904_v19 = vsel %vm1825_vm10, %v902_v3, %v903_v6 }
 0x488   :  { %v905_v22 = vsel %vm1826_vm11, %v899_v18, %v904_v19  ;;  %v1307_v23 = vld [vmem:[#allocation3 + $0x14] sm:$0xf0]  ;;  %v1258_v16 = vld [vmem:[#allocation3 + $0x18] sm:$0xf0] }
 0x489   :  { %907 = vst [vmem:[#allocation3 + $0x8] sm:$0xff] %v905_v22  ;;  %v1257_v27 = vor.u32 %v1307_v23, %v1256_v21  ;;  %v1261_v28 = vor.u32 %v1306_v24, %v1258_v16 }
 0x48b   :  { %1086 = vmatpush.bf16.msrb.mxu2 %v1257_v27  ;;  %1099 = vmatpush.bf16.msrb.mxu3 %v1261_v28 }
 0x490   :  { %v1305_v29 = vld [vmem:[#allocation3 + $0x4] sm:$0xf0]  ;;  %v1250_v31 = vld [vmem:[#allocation3 + $0x8] sm:$0xf0] }
 0x491   :  { %v1249_v32 = vor.u32 %v1305_v29, %v1248_v17  ;;  %v1253_v33 = vor.u32 %v1304_v30, %v1250_v31 }
 0x493   :  { %1087 = vmatpush.bf16.msrb.mxu2 %v1249_v32  ;;  %1100 = vmatpush.bf16.msrb.mxu3 %v1253_v33 }
 0x496   :  { %1278 = vmatmul.msk.bf16.vlgmr.msrb.gmra.mxu2 %vm1827_vm2, %v1016_v34  ;;  %1279 = vmatmul.msk.bf16.vlgmr.msrb.gmra.mxu3 %vm1828_vm5, %v1016_v34 }
 0x519   :  { %v1089_v41 = vpop.f32.mrf.mxu2  ;;  %v1102_v42 = vpop.f32.mrf.mxu3 }
 0x51a   :  { %1128 = vst [vmem:[%s1747_s3 + $0x40] sm:$0xff] %v1089_v41 }
 0x51b   :  { %1130 = vst [vmem:[%s1747_s3 + $0x48] sm:$0xff] %v1102_v42 }
 0x521   :  { %v1091_v43 = vpop.f32.mrf.mxu2  ;;  %v1104_v44 = vpop.f32.mrf.mxu3 }

</bundles_post_ra>
